<compile_context>
chip_gen: v7x
topology: tpu7x:2x2x1
jax: 0.10.0
libtpu: 0.0.40
codegen_flags: <defaults>
</compile_context>

<pallas_src>
import jax
import jax.numpy as jnp
from jax.experimental import pallas as pl
from jax.experimental.pallas import tpu as pltpu


# ----------------------------------------------------------------------------
# Kernel: one output-column slice per grid step (grid axis is "parallel").
#   t_ref  : (B, n_embd)      bf16, resident
#   w1_ref : (n_embd, H)      bf16, resident (same block every step)
#   b1_ref : (1, H)           f32,  resident
#   w2_ref : (H, H/n_split)   bf16, column slice j of linear_2 weight
#   b2_ref : (1, H/n_split)   f32,  slice j of linear_2 bias
#   o_ref  : (B, H/n_split)   f32,  output slice j
# ----------------------------------------------------------------------------
def _time_embedding_kernel(t_ref, w1_ref, b1_ref, w2_ref, b2_ref, o_ref):
    # Linear_1 (full hidden dim) with f32 accumulation, then SiLU.
    h = jnp.dot(t_ref[...], w1_ref[...], preferred_element_type=jnp.float32)
    h = h + b1_ref[...]
    h = h * jax.nn.sigmoid(h)  # SiLU

    # Linear_2 for this output-column slice.
    o_ref[...] = (
        jnp.dot(h.astype(w2_ref.dtype), w2_ref[...], preferred_element_type=jnp.float32)
        + b2_ref[...]
    ).astype(o_ref.dtype)


# ----------------------------------------------------------------------------
# Wrapper: TimeEmbedding forward.
#   t : (B, n_embd)            (pass bf16 for best perf; any float dtype works)
#   w1: (n_embd, 4*n_embd), b1: (4*n_embd,)
#   w2: (4*n_embd, 4*n_embd), b2: (4*n_embd,)
# Returns (B, 4*n_embd) f32.
# NOTE: cast w1/w2/t to bf16 ONCE at init (outside jit) so no per-call convert
# ops are paid; the .astype calls below are then no-ops.
# ----------------------------------------------------------------------------
def time_embedding(t, w1, b1, w2, b2):
    B, n_embd = t.shape
    H = w1.shape[1]

    # Split the output columns across (up to) 2 TensorCores when tiling allows.
    n_split = 2 if (H % 2 == 0 and (H // 2) % 128 == 0) else 1
    Hs = H // n_split

    t16 = t.astype(jnp.bfloat16)
    w1_16 = w1.astype(jnp.bfloat16)
    w2_16 = w2.astype(jnp.bfloat16)
    b1_f = b1.astype(jnp.float32).reshape(1, H)
    b2_f = b2.astype(jnp.float32).reshape(1, H)

    return pl.pallas_call(
        _time_embedding_kernel,
        out_shape=jax.ShapeDtypeStruct((B, H), jnp.float32),
        grid_spec=pltpu.PrefetchScalarGridSpec(
            num_scalar_prefetch=0,
            grid=(n_split,),
            in_specs=[
                pl.BlockSpec((B, n_embd), lambda j: (0, 0)),   # t (resident)
                pl.BlockSpec((n_embd, H), lambda j: (0, 0)),   # w1 (resident)
                pl.BlockSpec((1, H), lambda j: (0, 0)),        # b1 (resident)
                pl.BlockSpec((H, Hs), lambda j: (0, j)),       # w2 column slice
                pl.BlockSpec((1, Hs), lambda j: (0, j)),       # b2 slice
            ],
            out_specs=pl.BlockSpec((B, Hs), lambda j: (0, j)),  # output slice
        ),
        compiler_params=pltpu.CompilerParams(
            dimension_semantics=("parallel",),  # independent output-column halves
        ),
    )(t16, w1_16, b1_f, w2_16, b2_f)


if __name__ == "__main__":
    key = jax.random.PRNGKey(0)
    kt, k1, kb1, k2, kb2 = jax.random.split(key, 5)

    n_embd = 320                # TimeEmbedding(320) as used in sd/diffusion.py
    hidden = 4 * n_embd         # 1280
    B = 2

    t = jax.random.normal(kt, (B, n_embd), jnp.float32)
    w1 = 0.02 * jax.random.normal(k1, (n_embd, hidden), jnp.float32)
    b1 = 0.01 * jax.random.normal(kb1, (hidden,), jnp.float32)
    w2 = 0.02 * jax.random.normal(k2, (hidden, hidden), jnp.float32)
    b2 = 0.01 * jax.random.normal(kb2, (hidden,), jnp.float32)

    # Cast weights/activation to bf16 ONCE, outside the jitted forward
    # (per review: avoids per-call convert ops that triple HBM traffic).
    t_bf = t.astype(jnp.bfloat16)
    w1_bf = w1.astype(jnp.bfloat16)
    w2_bf = w2.astype(jnp.bfloat16)

    fwd = jax.jit(time_embedding)
    out = fwd(t_bf, w1_bf, b1, w2_bf, b2)
    jax.block_until_ready(out)

    # Pure-JAX reference with the same bf16 weight/activation quantization.
    tq = t_bf.astype(jnp.float32)
    w1q = w1_bf.astype(jnp.float32)
    w2q = w2_bf.astype(jnp.float32)
    h = tq @ w1q + b1
    h = h * jax.nn.sigmoid(h)
    ref = h.astype(jnp.bfloat16).astype(jnp.float32) @ w2q + b2

    assert out.shape == (B, hidden) and out.dtype == jnp.float32
    assert bool(jnp.all(jnp.isfinite(out)))
    assert bool(jnp.allclose(out, ref, rtol=2e-2, atol=2e-2))
    print("KERNEL_OK")
</pallas_src>

<mosaic_0001>
module attributes {stable_mosaic.version = 11 : i64} {
  func.func @_time_embedding_kernel(%arg0: i32, %arg1: memref<2x320xbf16, #tpu.memory_space<vmem>>, %arg2: memref<320x1280xbf16, #tpu.memory_space<vmem>>, %arg3: memref<1x1280xf32, #tpu.memory_space<vmem>>, %arg4: memref<1280x640xbf16, #tpu.memory_space<vmem>>, %arg5: memref<1x640xf32, #tpu.memory_space<vmem>>, %arg6: memref<2x640xf32, #tpu.memory_space<vmem>>) attributes {dimension_semantics = [#tpu.dimension_semantics<parallel>], iteration_bounds = array<i64: 2>, scalar_prefetch = 0 : i64, scratch_operands = 0 : i64, tpu.core_type = #tpu.core_type<tc>, window_params = [{pipeline_mode = #tpu.pipeline_mode<synchronous>, transform_indices = @transform_0, window_bounds = array<i64: 2, 320>}, {pipeline_mode = #tpu.pipeline_mode<synchronous>, transform_indices = @transform_1, window_bounds = array<i64: 320, 1280>}, {pipeline_mode = #tpu.pipeline_mode<synchronous>, transform_indices = @transform_2, window_bounds = array<i64: 1, 1280>}, {transform_indices = @transform_3, window_bounds = array<i64: 1280, 640>}, {transform_indices = @transform_4, window_bounds = array<i64: 1, 640>}, {transform_indices = @transform_5, window_bounds = array<i64: 2, 640>}]} {
    %c0 = arith.constant 0 : index
    %c0_0 = arith.constant 0 : index
    %0 = vector.load %arg1[%c0, %c0_0] : memref<2x320xbf16, #tpu.memory_space<vmem>>, vector<2x320xbf16>
    %c0_1 = arith.constant 0 : index
    %c0_2 = arith.constant 0 : index
    %1 = vector.load %arg2[%c0_1, %c0_2] : memref<320x1280xbf16, #tpu.memory_space<vmem>>, vector<320x1280xbf16>
    %cst = arith.constant dense<0.000000e+00> : vector<2x1280xf32>
    %2 = tpu.matmul %0, %1, %cst {dimension_numbers = #tpu.dot_dimension_numbers<[1], [0], [0], [1], [0, 0, 1, 1], [], []>} : vector<2x320xbf16>, vector<320x1280xbf16>, vector<2x1280xf32> -> vector<2x1280xf32>
    %c0_3 = arith.constant 0 : index
    %c0_4 = arith.constant 0 : index
    %3 = vector.load %arg3[%c0_3, %c0_4] : memref<1x1280xf32, #tpu.memory_space<vmem>>, vector<1x1280xf32>
    %4 = vector.broadcast %3 : vector<1x1280xf32> to vector<2x1280xf32>
    %5 = arith.addf %2, %4 : vector<2x1280xf32>
    %6 = arith.negf %5 : vector<2x1280xf32>
    %7 = math.exp %6 : vector<2x1280xf32>
    %cst_5 = arith.constant 1.000000e+00 : f32
    %8 = vector.broadcast %cst_5 : f32 to vector<2x1280xf32>
    %9 = arith.addf %8, %7 : vector<2x1280xf32>
    %10 = arith.divf %8, %9 : vector<2x1280xf32>
    %11 = arith.mulf %5, %10 : vector<2x1280xf32>
    %12 = arith.truncf %11 : vector<2x1280xf32> to vector<2x1280xbf16>
    %c0_6 = arith.constant 0 : index
    %c0_7 = arith.constant 0 : index
    %13 = vector.load %arg4[%c0_6, %c0_7] : memref<1280x640xbf16, #tpu.memory_space<vmem>>, vector<1280x640xbf16>
    %cst_8 = arith.constant dense<0.000000e+00> : vector<2x640xf32>
    %14 = tpu.matmul %12, %13, %cst_8 {dimension_numbers = #tpu.dot_dimension_numbers<[1], [0], [0], [1], [0, 0, 1, 1], [], []>} : vector<2x1280xbf16>, vector<1280x640xbf16>, vector<2x640xf32> -> vector<2x640xf32>
    %c0_9 = arith.constant 0 : index
    %c0_10 = arith.constant 0 : index
    %15 = vector.load %arg5[%c0_9, %c0_10] : memref<1x640xf32, #tpu.memory_space<vmem>>, vector<1x640xf32>
    %16 = vector.broadcast %15 : vector<1x640xf32> to vector<2x640xf32>
    %17 = arith.addf %14, %16 : vector<2x640xf32>
    %c0_11 = arith.constant 0 : index
    %c0_12 = arith.constant 0 : index
    %18 = vector.load %arg6[%c0_11, %c0_12] : memref<2x640xf32, #tpu.memory_space<vmem>>, vector<2x640xf32>
    tpu.vector_store %arg6[%c0_11, %c0_12], %17 {strides = array<i32>} : memref<2x640xf32, #tpu.memory_space<vmem>>, vector<2x640xf32>,
    return
  }
  func.func @transform_0(%arg0: i32) -> (i32, i32) {
    %c0_i32 = arith.constant 0 : i32
    %c0_i32_0 = arith.constant 0 : i32
    %c0_i32_1 = arith.constant 0 : i32
    return %c0_i32, %c0_i32_0 : i32, i32
  }
  func.func @transform_1(%arg0: i32) -> (i32, i32) {
    %c0_i32 = arith.constant 0 : i32
    %c0_i32_0 = arith.constant 0 : i32
    %c0_i32_1 = arith.constant 0 : i32
    return %c0_i32, %c0_i32_0 : i32, i32
  }
  func.func @transform_2(%arg0: i32) -> (i32, i32) {
    %c0_i32 = arith.constant 0 : i32
    %c0_i32_0 = arith.constant 0 : i32
    %c0_i32_1 = arith.constant 0 : i32
    return %c0_i32, %c0_i32_0 : i32, i32
  }
  func.func @transform_3(%arg0: i32) -> (i32, i32) {
    %c0_i32 = arith.constant 0 : i32
    %c0_i32_0 = arith.constant 0 : i32
    return %c0_i32, %arg0 : i32, i32
  }
  func.func @transform_4(%arg0: i32) -> (i32, i32) {
    %c0_i32 = arith.constant 0 : i32
    %c0_i32_0 = arith.constant 0 : i32
    return %c0_i32, %arg0 : i32, i32
  }
  func.func @transform_5(%arg0: i32) -> (i32, i32) {
    %c0_i32 = arith.constant 0 : i32
    %c0_i32_0 = arith.constant 0 : i32
    return %c0_i32, %arg0 : i32, i32
  }
}

</mosaic_0001>

<bundles_post_ra>
// kernel: time_embedding.1
= control target key start
LH: loop header
LB: loop body
LE: loop exit
PB: predicated region body
PF: predicated region fallthrough
CT: control target
= control target key end

     0   :  { %s8227_s0 = inlined_call_operand.hbm [shape: bf16[2,320], index: 0, kind: input, shape index: {}]   ;;  %s8228_s1 = inlined_call_operand.hbm [shape: bf16[320,1280], index: 1, kind: input, shape index: {}]   ;;  %s8229_s2 = inlined_call_operand.vmem [shape: f32[1,1280], index: 2, kind: input, shape index: {}]   ;;  %s8230_s3 = inlined_call_operand.hbm [shape: bf16[1280,1280], index: 3, kind: input, shape index: {}]   ;;  %s8231_s4 = inlined_call_operand.vmem [shape: f32[1,1280], index: 4, kind: input, shape index: {}]   ;;  %s8232_s5 = inlined_call_operand.hbm [shape: f32[2,1280], index: 5, kind: output, shape index: {}]  }
   0x1   :  { %8238 = sst [smem:[#allocation14_spill]] %s8227_s0 }
   0x2   :  { %10 = vsyncpa [#allocation3], 0 }
   0x3   :  { %11 = vsyncpa [#allocation6], 0 }
   0x4   :  { %12 = vsyncpa [#allocation4], 0 }
   0x5   :  { %14 = vsyncpa [#allocation4 + $0x1], 0  ;;  %s7396_s18 = smov 0   ;;  %s7398_s19 = smov 0  }
   0x6   :  { %s7400_s20 = smov 0   ;;  %s7402_s21 = smov 0  }
   0x7 LB: > { %s7417_s22 = sadd.s32 4294967295, %s7353_s21   ;;  %s5408_s23 = sadd.s32 4294967294, %s7353_s21   ;;  %s7353_s21 = sphi %s7402_s21, %s8263_s21   ;;  %s7349_s20 = sphi %s7400_s20, %s8262_s20   ;;  %s7345_s19 = sphi %s7398_s19, %s8261_s19   ;;  %s7341_s18 = sphi %s7396_s18, %s8260_s18  }
   0x8   : > { %s7421_s24 = sadd.s32 1, %s7353_s21   ;;  %s90_s25 = sadd.s32 1, %s7349_s20 }
   0x9   : > { %s87_s26 = ssub.s32 %s7353_s21, %s7421_s24  ;;  %p97_p0 = scmp.ne.s32.totalorder %s7349_s20, %s7345_s19 }
   0xa   : > { %p88_p1 = scmp.eq.s32.totalorder %s87_s26, 0  ;;  %p98_p2 = scmp.eq.s32.totalorder %s7353_s21, 0 }
   0xb   : > { %p103_p3 = scmp.ne.s32.totalorder %s7345_s19, %s7341_s18  ;;  %p8233_p4 = scmp.eq.s32.totalorder %s7417_s22, 0 }
   0xc   : > { %s7433_s27 = scalar_select %p88_p1, %s7349_s20, %s90_s25  }
   0xd   : > { %p7435_p5 = por %p98_p2, %p97_p0  ;;  %p7441_p6 = por %p8233_p4, %p103_p3 }
   0xe   : > { %8239 = sst [smem:[#allocation13_spill]] %s7433_s27  ;;  %p153_p7 = scmp.eq.s32.totalorder %s7417_s22, 1 }
   0xf   : > { %s8241_s29 = scalar_select %p7441_p6, 1, 0 }
  0x10   : > { %p159_p8 = scmp.eq.s32.totalorder %s5408_s23, 1  ;;  %p5409_p9 = scmp.ge.s32.totalorder %s7353_s21, 1 }
  0x11   : > { %p166_p10 = scmp.lt.s32.totalorder %s7353_s21, 3  ;;  %p7448_p11 = por %p153_p7, %p97_p0 }
  0x12   : > { %p7452_p12 = por %p159_p8, %p103_p3  ;;  %s7355_s8 = smov [#allocation2]  }
  0x13   : > { %s8242_s30 = scalar_select %p7448_p11, 1, 0 }
  0x14   : > { %s8243_s6 = scalar_select %p7452_p12, 1, 0 }
  0x15   : > { %p7456_p13 = pnand %p5409_p9, %p166_p10  ;;  %s179_s9 = sshll.u32 %s7355_s8, 4  ;;  %s180_s9 = int_to_ptr.vmem [resolvable:$true] %s179_s9 }
  0x16   : > { %p6247_p4 = scmp.lt.s32.totalorder %s7353_s21, 2  ;;  %p8245_p0 = scmp.eq.s32.totalorder %s7417_s22, 0 }
  0x17   : > { %s8244_s7 = scalar_select %p7456_p13, 1, 0 }
  0x18   : > { %p6230_p2 = pneg %p7456_p13  ;;  %p7472_p3 = pnand %p6247_p4, %p7435_p5 }
  0x19   : > { %s7356_s12 = smov [#allocation5]   ;;  %s8248_s0 = sld [smem:[#allocation14_spill]] }
  0x1a   : > { %p7466_p7 = pnand %p6230_p2, %p8245_p0  ;;  %s189_s13 = sshll.u32 %s7356_s12, 4  ;;  %s7476_s13 = int_to_ptr.vmem [resolvable:$true] %s189_s13 }
  0x1b   : > { %s8247_s11 = scalar_select %p7472_p3, 1, 0 }
  0x1c   : > { %p7195_p9 = pneg %p7466_p7 }
  0x1f   : > { %s7193_s16 = scalar_lea.hbm %s8248_s0, 48 }
  0x20   : > { %p7194_p8 = scmp.ne.s32.totalorder %s8248_s0, %s7193_s16  ;;  %p7200_p10 = scmp.lt.u32.totalorder %s7193_s16, %s8248_s0 }
  0x22   : > { %p7196_p4 = pnand %p7195_p9, %p7194_p8 }
  0x24   : > { %p7197_p5 = pneg %p7196_p4 }
  0x26   : > { %p7202_p2 = pnand %p7200_p10, %p7197_p5 }
  0x28   : > { %7205 = shalt.err (!%p7202_p2)
}
  0x29   : > { %s7206_s28 = scalar_lea.vmem %s180_s9, 48  ;;  %s7213_s8 = scalar_lea.vmem %s180_s9, 64 }
  0x2a   : > { %p7207_p0 = scmp.ne.s32.totalorder %s180_s9, %s7206_s28  ;;  %p7214_p11 = scmp.lt.s32.totalorder %s180_s9, %s180_s9 }
  0x2b   : > { %p7215_p6 = scmp.lt.s32.totalorder %s7213_s8, %s7206_s28 }
  0x2c   : > { %p7209_p1 = pnand %p7207_p0, %p7195_p9 }
  0x2d   : > { %p7216_p13 = por %p7215_p6, %p7214_p11 }
  0x2e   : > { %p7210_p12 = pneg %p7209_p1 }
  0x30   : > { %p7217_p3 = pnand %p7216_p13, %p7210_p12 }
  0x32   : > { %7220 = shalt.err (!%p7217_p3)
}
  0x33   : > { %6233 = dma.hbm_to_vmem [thread:$0]  (!%p7466_p7), %s8248_s0, 48, %s180_s9, [#allocation3]  }
  0x34   : > { %s206_s15 = sand.u32 1, %s7353_s21   ;;  %s7221_s23 = scalar_lea.hbm %s8228_s1, 25600 }
  0x35   : > { %p7222_p1 = scmp.ne.s32.totalorder %s8228_s1, %s7221_s23  ;;  %p7228_p12 = scmp.lt.u32.totalorder %s7221_s23, %s8228_s1 }
  0x37   : > { %p7224_p6 = pnand %p7222_p1, %p7195_p9 }
  0x39   : > { %p7225_p11 = pneg %p7224_p6 }
  0x3b   : > { %p7230_p13 = pnand %p7228_p12, %p7225_p11 }
  0x3d   : > { %7233 = shalt.err (!%p7230_p13)
}
  0x3e   : > { %s7234_s9 = scalar_lea.vmem %s7476_s13, 25600  ;;  %p7242_p5 = scmp.lt.s32.totalorder %s7476_s13, %s7476_s13 }
  0x3f   : > { %p7235_p3 = scmp.ne.s32.totalorder %s7476_s13, %s7234_s9  ;;  %p7243_p10 = scmp.lt.s32.totalorder %s7234_s9, %s7234_s9 }
  0x41   : > { %p7237_p8 = pnand %p7235_p3, %p7195_p9  ;;  %p7244_p2 = por %p7243_p10, %p7242_p5 }
  0x43   : > { %p7238_p4 = pneg %p7237_p8 }
  0x45   : > { %p7245_p0 = pnand %p7244_p2, %p7238_p4 }
  0x47   : > { %7248 = shalt.err (!%p7245_p0)
}
  0x48   : > { %s7357_s12 = smov 640   ;;  %s7358_s14 = smov 40  }
  0x49   : > { %6236 = dma.hbm_to_vmem [thread:$0]  (!%p7466_p7), %s8228_s1, 25600, %s7476_s13, [#allocation6], %s7357_s12, %s7357_s12, %s7358_s14  }
  0x4a   : > { %s208_s23 = sand.u32 1, %s7349_s20   ;;  %s6037_s26 = smul.u32 320, %s7353_s21 }
  0x4b   : > { %s6215_s25 = smul.u32 3200, %s208_s23  ;;  %s7537_s27 = scalar_lea.sflag [#allocation3], %s206_s15 }
  0x4c   : > { %s7533_s9 = scalar_lea.hbm %s8230_s3, %s6037_s26  ;;  %p8249_p9 = scmp.ne.s32.totalorder %s8247_s11, 0 }
  0x4d   : > { %s210_s0 = scalar_lea.vmem [#allocation7], %s6215_s25  ;;  %s7249_s16 = scalar_lea.hbm %s7533_s9, 51200 }
  0x4e   : > { %s217_s10 = sshll.u32 %s210_s0, 4  ;;  %p7250_p7 = scmp.ne.s32.totalorder %s7533_s9, %s7249_s16  ;;  %s7535_s10 = int_to_ptr.vmem [resolvable:$true] %s217_s10 }
  0x4f   : > { %p7251_p1 = pneg %p8249_p9  ;;  %s7254_s17 = scalar_lea.hbm %s8230_s3, 102400 }
  0x50   : > { %p7255_p12 = scmp.lt.u32.totalorder %s7533_s9, %s8230_s3  ;;  %p7256_p13 = scmp.lt.u32.totalorder %s7254_s17, %s7249_s16 }
  0x51   : > { %p7252_p6 = pnand %p7251_p1, %p7250_p7  ;;  %p7258_p8 = scmp.lt.u32.totalorder %s7249_s16, %s7533_s9 }
  0x52   : > { %p7257_p3 = por %p7256_p13, %p7255_p12 }
  0x53   : > { %p7253_p11 = pneg %p7252_p6 }
  0x54   : > { %p7259_p4 = por %p7258_p8, %p7257_p3 }
  0x56   : > { %p7260_p5 = pnand %p7259_p4, %p7253_p11 }
  0x58   : > { %7263 = shalt.err (!%p7260_p5)
}
  0x59   : > { %s7264_s0 = scalar_lea.vmem %s7535_s10, 51200  ;;  %s7359_s15 = smov [#allocation7]  }
  0x5a   : > { %p7265_p10 = scmp.ne.s32.totalorder %s7535_s10, %s7264_s0  ;;  %s7269_s25 = sshll.u32 %s7359_s15, 4  ;;  %s7270_s25 = int_to_ptr.vmem [resolvable:$false] %s7269_s25 }
  0x5b   : > { %s7271_s28 = scalar_lea.vmem %s7270_s25, 102400  ;;  %p7272_p7 = scmp.lt.s32.totalorder %s7535_s10, %s7270_s25 }
  0x5c   : > { %p7267_p2 = pnand %p7265_p10, %p7251_p1  ;;  %p7273_p6 = scmp.lt.s32.totalorder %s7271_s28, %s7264_s0 }
  0x5e   : > { %p7268_p0 = pneg %p7267_p2  ;;  %p7274_p12 = por %p7273_p6, %p7272_p7 }
  0x60   : > { %p7275_p13 = pnand %p7274_p12, %p7268_p0 }
  0x62   : > { %7278 = shalt.err (!%p7275_p13)
}
  0x63   : > { %s7360_s8 = smov 320   ;;  %s7361_s16 = smov 20  }
  0x64   : > { %6240 = dma.hbm_to_vmem [thread:$0]  (!%p8249_p9), %s7533_s9, 51200, %s7535_s10, %s7537_s27, %s7357_s12, %s7360_s8, %s7361_s16  }
  0x65   : > { %p8250_p1 = scmp.ne.s32.totalorder %s8244_s7, 0 }
  0x66   : > { %p8251_p11 = scmp.eq.s32.totalorder (!%p8250_p1), %s7417_s22, 0 }
  0x67   : > { %237 = sbr.rel (%p8250_p1) target bundleno = 1062 (0x426), region = 40 }
  0x6e   : > { %7324 = dma.done.wait (%p8251_p11), [#allocation3], 48   ;;  %p8252_p3 = pmov %p8251_p11 }
  0x70   : > { %7326 = vsyncadd (%p8252_p3), [#allocation3], 4294967248  ;;  %p8253_p8 = pmov %p8252_p3 }
  0x71   : > { %p8254_p4 = pmov %p8252_p3 }
  0x72   : > { %7328 = dma.done.wait (%p8253_p8), [#allocation6], 25600  }
  0x73   : > { %7330 = vsyncadd (%p8254_p4), [#allocation6], 4294941696  ;;  %s247_s11 = sand.u32 1, %s7417_s22   ;;  %s7578_s27 = sand.u32 1, %s7345_s19  }
  0x74   : > { %s6216_s7 = smul.u32 3200, %s7578_s27  ;;  %s248_s12 = scalar_lea.sflag [#allocation3], %s247_s11 }
  0x75   : > { %p8255_p9 = scmp.ne.s32.totalorder %s8241_s29, 0 }
  0x76   : > { %s7581_s9 = scalar_lea.vmem [#allocation7], %s6216_s7 }
  0x77   : > { %7332 = dma.done.wait (%p8255_p9), %s248_s12, 51200  }
  0x78   : > { %7334 = vsyncadd (%p8255_p9), %s248_s12, 4294916096  ;;  %v6292_v0 = vld [vmem:[#allocation5 + $0x4] ss:$40 sps:$4 sm:$0xff]   ;;  %v6294_v1 = vld [vmem:[#allocation5] ss:$40 sps:$4 sm:$0xff]   ;;  %v495_v29 = vlaneseq  ;;  %vm1571_vm0 = vcmask 523264  }
  0x79   : > { %1575 = vmatprep.subr.bf16.mxu0 %v6292_v0  ;;  %v6295_v2 = vld [vmem:[#allocation5 + $0x54] ss:$40 sps:$4 sm:$0xff]   ;;  %v6297_v3 = vld [vmem:[#allocation5 + $0x50] ss:$40 sps:$4 sm:$0xff]   ;;  %v6298_v4 = vld [vmem:[#allocation5 + $0xa4] ss:$40 sps:$4 sm:$0xff]  }
  0x7a   : > { %1576 = vmatpush1.bf16.msra.mxu0 %v6294_v1  ;;  %v6300_v5 = vld [vmem:[#allocation5 + $0xa0] ss:$40 sps:$4 sm:$0xff]   ;;  %v6301_v6 = vld [vmem:[#allocation5 + $0xf4] ss:$40 sps:$4 sm:$0xff]   ;;  %v6303_v9 = vld [vmem:[#allocation5 + $0xf0] ss:$40 sps:$4 sm:$0xff]  }
  0x7b   : > { %1577 = vmatprep.subr.bf16.mxu0 %v6295_v2  ;;  %v6310_v7 = vld [vmem:[#allocation5 + $0xc] ss:$40 sps:$4 sm:$0xff]   ;;  %v6312_v8 = vld [vmem:[#allocation5 + $0x8] ss:$40 sps:$4 sm:$0xff]   ;;  %v6316_v10 = vld [vmem:[#allocation5 + $0x5c] ss:$40 sps:$4 sm:$0xff]  }
  0x7c   : > { %1657 = vmatprep.subr.bf16.mxu1 %v6310_v7  ;;  %v6318_v11 = vld [vmem:[#allocation5 + $0x58] ss:$40 sps:$4 sm:$0xff]   ;;  %v6304_v12 = vld [vmem:[#allocation5 + $0x144] ss:$40 sps:$4 sm:$0xff]   ;;  %v6307_v15 = vld [vmem:[#allocation5 + $0x194] ss:$40 sps:$4 sm:$0xff]  }
  0x7d   : > { %1658 = vmatpush1.bf16.msra.mxu1 %v6312_v8  ;;  %v6306_v13 = vld [vmem:[#allocation5 + $0x140] ss:$40 sps:$4 sm:$0xff]   ;;  %v6322_v14 = vld [vmem:[#allocation5 + $0xac] ss:$40 sps:$4 sm:$0xff]   ;;  %v6328_v17 = vld [vmem:[#allocation5 + $0xfc] ss:$40 sps:$4 sm:$0xff]  }
  0x7e   : > { %1578 = vmatpush1.bf16.msra.mxu0 %v6297_v3  ;;  %1659 = vmatprep.subr.bf16.mxu1 %v6316_v10  ;;  %v6324_v16 = vld [vmem:[#allocation5 + $0xa8] ss:$40 sps:$4 sm:$0xff]   ;;  %v6313_v19 = vld [vmem:[#allocation5 + $0x1e4] ss:$40 sps:$4 sm:$0xff]   ;;  %v6330_v20 = vld [vmem:[#allocation5 + $0xf8] ss:$40 sps:$4 sm:$0xff]  }
  0x7f   : > { %1579 = vmatprep.subr.bf16.mxu0 %v6298_v4  ;;  %v6309_v18 = vld [vmem:[#allocation5 + $0x190] ss:$40 sps:$4 sm:$0xff]   ;;  %v6334_v21 = vld [vmem:[#allocation5 + $0x14c] ss:$40 sps:$4 sm:$0xff]   ;;  %v6315_v22 = vld [vmem:[#allocation5 + $0x1e0] ss:$40 sps:$4 sm:$0xff]  }
  0x80   : > { %v6319_v23 = vld [vmem:[#allocation5 + $0x234] ss:$40 sps:$4 sm:$0xff]   ;;  %v6336_v24 = vld [vmem:[#allocation5 + $0x148] ss:$40 sps:$4 sm:$0xff]   ;;  %v6325_v27 = vld [vmem:[#allocation5 + $0x284] ss:$40 sps:$4 sm:$0xff]  }
  0x81   : > { %1660 = vmatpush1.bf16.msra.mxu1 %v6318_v11  ;;  %v6340_v25 = vld [vmem:[#allocation5 + $0x19c] ss:$40 sps:$4 sm:$0xff]   ;;  %v6321_v26 = vld [vmem:[#allocation5 + $0x230] ss:$40 sps:$4 sm:$0xff]   ;;  %v7362_v30 = vmov 1966171168  }
  0x82   : > { %1580 = vmatpush1.bf16.msra.mxu0 %v6300_v5  ;;  %1661 = vmatprep.subr.bf16.mxu1 %v6322_v14  ;;  %v6342_v28 = vld [vmem:[#allocation5 + $0x198] ss:$40 sps:$4 sm:$0xff]   ;;  %v555_v31 = vunpack.c.l.s4 %v7362_v30  ;;  %v6346_v32 = vld [vmem:[#allocation5 + $0x1ec] ss:$40 sps:$4 sm:$0xff]   ;;  %v6348_v35 = vld [vmem:[#allocation5 + $0x1e8] ss:$40 sps:$4 sm:$0xff]  }
  0x83   : > { %1581 = vmatprep.subr.bf16.mxu0 %v6301_v6  ;;  %v6327_v33 = vld [vmem:[#allocation5 + $0x280] ss:$40 sps:$4 sm:$0xff]   ;;  %v6331_v34 = vld [vmem:[#allocation5 + $0x2d4] ss:$40 sps:$4 sm:$0xff]   ;;  %v7587_v36 = vshrl.u32 %v495_v29, 7  ;;  %v7363_v14 = vmov 0  }
  0x84   : > { %v556_v37 = vunpack.c.0.s8 %v555_v31  ;;  %v6352_v38 = vld [vmem:[#allocation5 + $0x23c] ss:$40 sps:$4 sm:$0xff]   ;;  %v6333_v39 = vld [vmem:[#allocation5 + $0x2d0] ss:$40 sps:$4 sm:$0xff]   ;;  %v6358_v42 = vld [vmem:[#allocation5 + $0x28c] ss:$40 sps:$4 sm:$0xff]  }
  0x85   : > { %1662 = vmatpush1.bf16.msra.mxu1 %v6324_v16  ;;  %v6337_v40 = vld [vmem:[#allocation5 + $0x324] ss:$40 sps:$4 sm:$0xff]   ;;  %v6354_v41 = vld [vmem:[#allocation5 + $0x238] ss:$40 sps:$4 sm:$0xff]   ;;  %v6343_v47 = vld [vmem:[#allocation5 + $0x374] ss:$40 sps:$4 sm:$0xff]  }
  0x86   : > { %1582 = vmatpush1.bf16.msra.mxu0 %v6303_v9  ;;  %1663 = vmatprep.subr.bf16.mxu1 %v6328_v17  ;;  %v559_v43 = vsub.s32 %v556_v37, %v7587_v36  ;;  %v5417_v44 = vld.sshfl [vmem:[#allocation2] sm:$0x13 pattern:$0x75316420]  ;;  %v6339_v46 = vld [vmem:[#allocation5 + $0x320] ss:$40 sps:$4 sm:$0xff]  }
  0x87   : > { %1583 = vmatprep.subr.bf16.mxu0 %v6304_v12  ;;  %v553_v45 = vcombine.high %v5417_v44, %v5417_v44  ;;  %v6360_v48 = vld [vmem:[#allocation5 + $0x288] ss:$40 sps:$4 sm:$0xff]   ;;  %v6364_v50 = vld [vmem:[#allocation5 + $0x2dc] ss:$40 sps:$4 sm:$0xff]   ;;  %v6366_v53 = vld [vmem:[#allocation5 + $0x2d8] ss:$40 sps:$4 sm:$0xff]  }
  0x88   : > { %v6345_v51 = vld [vmem:[#allocation5 + $0x370] ss:$40 sps:$4 sm:$0xff]   ;;  %v6349_v52 = vld [vmem:[#allocation5 + $0x3c4] ss:$40 sps:$4 sm:$0xff]   ;;  %v6351_v55 = vld [vmem:[#allocation5 + $0x3c0] ss:$40 sps:$4 sm:$0xff]   ;;  %v7594_v7 = vrot.slane %v5417_v44, %v559_v43 }
  0x89   : > { %1664 = vmatpush1.bf16.msra.mxu1 %v6330_v20  ;;  %v7590_v49 = vrot.slane %v553_v45, %v559_v43  ;;  %v6370_v54 = vld [vmem:[#allocation5 + $0x32c] ss:$40 sps:$4 sm:$0xff]   ;;  %v6372_v57 = vld [vmem:[#allocation5 + $0x328] ss:$40 sps:$4 sm:$0xff]   ;;  %v6376_v58 = vld [vmem:[#allocation5 + $0x37c] ss:$40 sps:$4 sm:$0xff]  }
  0x8a   : > { %1584 = vmatpush1.bf16.msra.mxu0 %v6306_v13  ;;  %1665 = vmatprep.subr.bf16.mxu1 %v6334_v21  ;;  %v6355_v56 = vld [vmem:[#allocation5 + $0x414] ss:$40 sps:$4 sm:$0xff]   ;;  %v6357_v59 = vld [vmem:[#allocation5 + $0x410] ss:$40 sps:$4 sm:$0xff]   ;;  %v6361_v60 = vld [vmem:[#allocation5 + $0x464] ss:$40 sps:$4 sm:$0xff]  }
  0x8b   : > { %1585 = vmatprep.subr.bf16.mxu0 %v6307_v15  ;;  %1607 = vmatprep.mubr.bf16.mxu0 %v7590_v49  ;;  %v6378_v61 = vld [vmem:[#allocation5 + $0x378] ss:$40 sps:$4 sm:$0xff]   ;;  %v6382_v62 = vld [vmem:[#allocation5 + $0x3cc] ss:$40 sps:$4 sm:$0xff]   ;;  %v6384_v1 = vld [vmem:[#allocation5 + $0x3c8] ss:$40 sps:$4 sm:$0xff]  }
  0x8c   : > { %1689 = vmatprep.mubr.bf16.mxu1 %v7590_v49  ;;  %v6363_v63 = vld [vmem:[#allocation5 + $0x460] ss:$40 sps:$4 sm:$0xff]   ;;  %v6367_v0 = vld [vmem:[#allocation5 + $0x4b4] ss:$40 sps:$4 sm:$0xff]   ;;  %v6369_v3 = vld [vmem:[#allocation5 + $0x4b0] ss:$40 sps:$4 sm:$0xff]  }
  0x8d   : > { %1666 = vmatpush1.bf16.msra.mxu1 %v6336_v24  ;;  %v6388_v2 = vld [vmem:[#allocation5 + $0x41c] ss:$40 sps:$4 sm:$0xff]   ;;  %v6390_v5 = vld [vmem:[#allocation5 + $0x418] ss:$40 sps:$4 sm:$0xff]   ;;  %v6394_v6 = vld [vmem:[#allocation5 + $0x46c] ss:$40 sps:$4 sm:$0xff]  }
  0x8e   : > { %1586 = vmatpush1.bf16.msra.mxu0 %v6309_v18  ;;  %1667 = vmatprep.subr.bf16.mxu1 %v6340_v25  ;;  %v6375_v4 = vld [vmem:[#allocation5 + $0x504] ss:$40 sps:$4 sm:$0xff]   ;;  %v6373_v8 = vld [vmem:[#allocation5 + $0x500] ss:$40 sps:$4 sm:$0xff]   ;;  %v6381_v9 = vld [vmem:[#allocation5 + $0x554] ss:$40 sps:$4 sm:$0xff]   ;;  %v7602_v25 = vcombine.high %v7594_v7, %v7594_v7 }
  0x8f   : > { %1587 = vmatprep.subr.bf16.mxu0 %v6313_v19  ;;  %v6396_v10 = vld [vmem:[#allocation5 + $0x468] ss:$40 sps:$4 sm:$0xff]   ;;  %v6397_v11 = vld [vmem:[#allocation5 + $0x4bc] ss:$40 sps:$4 sm:$0xff]   ;;  %v6399_v15 = vld [vmem:[#allocation5 + $0x4b8] ss:$40 sps:$4 sm:$0xff]  }
  0x90   : > { %v6379_v12 = vld [vmem:[#allocation5 + $0x550] ss:$40 sps:$4 sm:$0xff]   ;;  %v6387_v13 = vld [vmem:[#allocation5 + $0x5a4] ss:$40 sps:$4 sm:$0xff]   ;;  %v6385_v17 = vld [vmem:[#allocation5 + $0x5a0] ss:$40 sps:$4 sm:$0xff]  }
  0x91   : > { %1668 = vmatpush1.bf16.msra.mxu1 %v6342_v28  ;;  %v6402_v16 = vld [vmem:[#allocation5 + $0x50c] ss:$40 sps:$4 sm:$0xff]   ;;  %v6400_v19 = vld [vmem:[#allocation5 + $0x508] ss:$40 sps:$4 sm:$0xff]   ;;  %v6408_v20 = vld [vmem:[#allocation5 + $0x55c] ss:$40 sps:$4 sm:$0xff]  }
  0x92   : > { %1588 = vmatpush1.bf16.msra.mxu0 %v6315_v22  ;;  %1669 = vmatprep.subr.bf16.mxu1 %v6346_v32  ;;  %v6393_v18 = vld [vmem:[#allocation5 + $0x5f4] ss:$40 sps:$4 sm:$0xff]   ;;  %v6391_v21 = vld [vmem:[#allocation5 + $0x5f0] ss:$40 sps:$4 sm:$0xff]   ;;  %v6409_v30 = vld [vmem:[#allocation5 + $0x60] ss:$40 sps:$4 sm:$0xff]  }
  0x93   : > { %1589 = vmatprep.subr.bf16.mxu0 %v6319_v23  ;;  %v6405_v22 = vld [vmem:[#allocation5 + $0x14] ss:$40 sps:$4 sm:$0xff]   ;;  %v6406_v23 = vld [vmem:[#allocation5 + $0x558] ss:$40 sps:$4 sm:$0xff]   ;;  %v6412_v28 = vld [vmem:[#allocation5 + $0x5a8] ss:$40 sps:$4 sm:$0xff]  }
  0x94   : > { %v6414_v24 = vld [vmem:[#allocation5 + $0x5ac] ss:$40 sps:$4 sm:$0xff]   ;;  %v6420_v29 = vld [vmem:[#allocation5 + $0x5fc] ss:$40 sps:$4 sm:$0xff]   ;;  %v6418_v32 = vld [vmem:[#allocation5 + $0x5f8] ss:$40 sps:$4 sm:$0xff]  }
  0x95   : > { %1670 = vmatpush1.bf16.msra.mxu1 %v6348_v35  ;;  %v6417_v31 = vld [vmem:[#allocation5 + $0xb4] ss:$40 sps:$4 sm:$0xff]   ;;  %v6423_v35 = vld [vmem:[#allocation5 + $0x104] ss:$40 sps:$4 sm:$0xff]   ;;  %v6454_v37 = vld [vmem:[#allocation5 + $0x18] ss:$40 sps:$4 sm:$0xff]  }
  0x96   : > { %1590 = vmatpush1.bf16.msra.mxu0 %v6321_v26  ;;  %1671 = vmatprep.subr.bf16.mxu1 %v6352_v38  ;;  %v6403_v26 = vld [vmem:[#allocation5 + $0x10] ss:$40 sps:$4 sm:$0xff]   ;;  %v6462_v38 = vld [vmem:[#allocation5 + $0x6c] ss:$40 sps:$4 sm:$0xff]   ;;  %s283_s26 = smul.u32 5, %s7417_s22  ;;  %s5296_s29 = scalar_lea.sflag [#allocation4], %s7578_s27 }
  0x97   : > { %1591 = vmatprep.subr.bf16.mxu0 %v6325_v27  ;;  %v6411_v27 = vld [vmem:[#allocation5 + $0x64] ss:$40 sps:$4 sm:$0xff]   ;;  %v6424_v43 = vld [vmem:[#allocation5 + $0x150] ss:$40 sps:$4 sm:$0xff]   ;;  %s6217_s28 = smul.u32 10, %s7578_s27  ;;  %p8256_p2 = scmp.ne.s32.totalorder %s8242_s30, 0 }
  0x98   : > { %v6429_v44 = vld [vmem:[#allocation5 + $0x1a4] ss:$40 sps:$4 sm:$0xff]   ;;  %v6466_v45 = vld [vmem:[#allocation5 + $0xb8] ss:$40 sps:$4 sm:$0xff]   ;;  %p284_p5 = scmp.lt.s32.totalorder %s283_s26, 9  ;;  %s6038_s16 = smul.u32 160, %s7417_s22 }
  0x99   : > { %1672 = vmatpush1.bf16.msra.mxu1 %v6354_v41  ;;  %v6460_v41 = vld [vmem:[#allocation5 + $0x68] ss:$40 sps:$4 sm:$0xff]   ;;  %s8172_s8 = scalar_lea.vmem [#allocation8], %s6217_s28  ;;  %s7365_s22 = smov [#allocation8]  }
  0x9a   : > { %1592 = vmatpush1.bf16.msra.mxu0 %v6327_v33  ;;  %1673 = vmatprep.subr.bf16.mxu1 %v6358_v42  ;;  %v6456_v33 = vld [vmem:[#allocation5 + $0x1c] ss:$40 sps:$4 sm:$0xff]   ;;  %s8265_s26 = smov (!%p284_p5, %s283_s26), 9  ;;  %s5310_s11 = sshll.u32 %s8172_s8, 4  ;;  %s8184_s11 = int_to_ptr.vmem [resolvable:$true] %s5310_s11 }
  0x9b   : > { %1593 = vmatprep.subr.bf16.mxu0 %v6331_v34  ;;  %v6415_v34 = vld [vmem:[#allocation5 + $0xb0] ss:$40 sps:$4 sm:$0xff]   ;;  %v6468_v42 = vld [vmem:[#allocation5 + $0xbc] ss:$40 sps:$4 sm:$0xff]   ;;  %s286_s25 = scalar_lea.vmem %s8231_s4, %s8265_s26  ;;  %s7279_s10 = scalar_lea.vmem %s8184_s11, 160 }
  0x9c   : > { %p7280_p10 = scmp.ne.s32.totalorder %s8184_s11, %s7279_s10  ;;  %s7283_s13 = sshll.u32 %s7365_s22, 4  ;;  %s7284_s13 = int_to_ptr.vmem [resolvable:$false] %s7283_s13 }
  0x9d   : > { %1674 = vmatpush1.bf16.msra.mxu1 %v6360_v48  ;;  %v6432_v48 = vld [vmem:[#allocation5 + $0x1f4] ss:$40 sps:$4 sm:$0xff]   ;;  %s7285_s14 = scalar_lea.vmem %s7284_s13, 320  ;;  %p7286_p6 = scmp.lt.s32.totalorder %s8184_s11, %s7284_s13 }
  0x9e   : > { %1594 = vmatpush1.bf16.msra.mxu0 %v6333_v39  ;;  %1675 = vmatprep.subr.bf16.mxu1 %v6364_v50  ;;  %v6421_v39 = vld [vmem:[#allocation5 + $0x100] ss:$40 sps:$4 sm:$0xff]   ;;  %p7281_p0 = pnand %p7280_p10, %p8256_p2  ;;  %p7287_p12 = scmp.lt.s32.totalorder %s7285_s14, %s7279_s10 }
  0x9f   : > { %1595 = vmatprep.subr.bf16.mxu0 %v6337_v40  ;;  %v6426_v40 = vld [vmem:[#allocation5 + $0x154] ss:$40 sps:$4 sm:$0xff]   ;;  %v6472_v50 = vld [vmem:[#allocation5 + $0x108] ss:$40 sps:$4 sm:$0xff]  }
  0xa0   : > { %p7282_p7 = pneg %p7281_p0  ;;  %p7288_p13 = por %p7287_p12, %p7286_p6 }
  0xa1   : > { %1676 = vmatpush1.bf16.msra.mxu1 %v6366_v53  ;;  %v6435_v53 = vld [vmem:[#allocation5 + $0x244] ss:$40 sps:$4 sm:$0xff]  }
  0xa2   : > { %1596 = vmatpush1.bf16.msra.mxu0 %v6339_v46  ;;  %1677 = vmatprep.subr.bf16.mxu1 %v6370_v54  ;;  %v6474_v46 = vld [vmem:[#allocation5 + $0x10c] ss:$40 sps:$4 sm:$0xff]   ;;  %v6478_v54 = vld [vmem:[#allocation5 + $0x158] ss:$40 sps:$4 sm:$0xff]   ;;  %p7289_p1 = pnand %p7288_p13, %p7282_p7 }
  0xa3   : > { %1597 = vmatprep.subr.bf16.mxu0 %v6343_v47  ;;  %v6427_v47 = vld [vmem:[#allocation5 + $0x1a0] ss:$40 sps:$4 sm:$0xff]  }
  0xa5   : > { %1678 = vmatpush1.bf16.msra.mxu1 %v6372_v57  ;;  %v6438_v57 = vld [vmem:[#allocation5 + $0x294] ss:$40 sps:$4 sm:$0xff]  }
  0xa6   : > { %1598 = vmatpush1.bf16.msra.mxu0 %v6345_v51  ;;  %1679 = vmatprep.subr.bf16.mxu1 %v6376_v58  ;;  %v6480_v51 = vld [vmem:[#allocation5 + $0x15c] ss:$40 sps:$4 sm:$0xff]   ;;  %v6484_v58 = vld [vmem:[#allocation5 + $0x1a8] ss:$40 sps:$4 sm:$0xff]  }
  0xa7   : > { %1599 = vmatprep.subr.bf16.mxu0 %v6349_v52  ;;  %v6430_v52 = vld [vmem:[#allocation5 + $0x1f0] ss:$40 sps:$4 sm:$0xff]  }
  0xa9   : > { %1680 = vmatpush1.bf16.msra.mxu1 %v6378_v61  ;;  %v6441_v61 = vld [vmem:[#allocation5 + $0x2e4] ss:$40 sps:$4 sm:$0xff]  }
  0xaa   : > { %1600 = vmatpush1.bf16.msra.mxu0 %v6351_v55  ;;  %1681 = vmatprep.subr.bf16.mxu1 %v6382_v62  ;;  %v6486_v55 = vld [vmem:[#allocation5 + $0x1ac] ss:$40 sps:$4 sm:$0xff]   ;;  %v6490_v62 = vld [vmem:[#allocation5 + $0x1f8] ss:$40 sps:$4 sm:$0xff]  }
  0xab   : > { %1601 = vmatprep.subr.bf16.mxu0 %v6355_v56  ;;  %v6433_v56 = vld [vmem:[#allocation5 + $0x240] ss:$40 sps:$4 sm:$0xff]  }
  0xad   : > { %1682 = vmatpush1.bf16.msra.mxu1 %v6384_v1  ;;  %v6444_v1 = vld [vmem:[#allocation5 + $0x334] ss:$40 sps:$4 sm:$0xff]  }
  0xae   : > { %1602 = vmatpush1.bf16.msra.mxu0 %v6357_v59  ;;  %1683 = vmatprep.subr.bf16.mxu1 %v6388_v2  ;;  %v6492_v59 = vld [vmem:[#allocation5 + $0x1fc] ss:$40 sps:$4 sm:$0xff]   ;;  %v6493_v2 = vld [vmem:[#allocation5 + $0x248] ss:$40 sps:$4 sm:$0xff]  }
  0xaf   : > { %1603 = vmatprep.subr.bf16.mxu0 %v6361_v60  ;;  %v6436_v60 = vld [vmem:[#allocation5 + $0x290] ss:$40 sps:$4 sm:$0xff]  }
  0xb1   : > { %1684 = vmatpush1.bf16.msra.mxu1 %v6390_v5  ;;  %v6447_v5 = vld [vmem:[#allocation5 + $0x384] ss:$40 sps:$4 sm:$0xff]  }
  0xb2   : > { %1604 = vmatpush1.bf16.msra.mxu0 %v6363_v63  ;;  %1685 = vmatprep.subr.bf16.mxu1 %v6394_v6  ;;  %v6495_v63 = vld [vmem:[#allocation5 + $0x24c] ss:$40 sps:$4 sm:$0xff]   ;;  %v6496_v6 = vld [vmem:[#allocation5 + $0x298] ss:$40 sps:$4 sm:$0xff]  }
  0xb3   : > { %1605 = vmatprep.subr.bf16.mxu0 %v6367_v0  ;;  %v6439_v0 = vld [vmem:[#allocation5 + $0x2e0] ss:$40 sps:$4 sm:$0xff]  }
  0xb5   : > { %1686 = vmatpush1.bf16.msra.mxu1 %v6396_v10  ;;  %v6450_v10 = vld [vmem:[#allocation5 + $0x3d4] ss:$40 sps:$4 sm:$0xff]  }
  0xb6   : > { %1606 = vmatpush1.bf16.msra.mxu0 %v6369_v3  ;;  %1687 = vmatprep.subr.bf16.mxu1 %v6397_v11  ;;  %v6498_v3 = vld [vmem:[#allocation5 + $0x29c] ss:$40 sps:$4 sm:$0xff]   ;;  %v6499_v11 = vld [vmem:[#allocation5 + $0x2e8] ss:$40 sps:$4 sm:$0xff]  }
  0xb7   : > { %1616 = vmatprep.subr.bf16.mxu0 %v6375_v4  ;;  %v6442_v4 = vld [vmem:[#allocation5 + $0x330] ss:$40 sps:$4 sm:$0xff]  }
  0xb9   : > { %1608 = vmatmul.mubr.bf16.vlgmr.msra.gmra.mrb[0].mxu0 %v7594_v7  ;;  %1688 = vmatpush1.bf16.msra.mxu1 %v6399_v15  ;;  %v6453_v15 = vld [vmem:[#allocation5 + $0x424] ss:$40 sps:$4 sm:$0xff]  }
  0xba   : > { %1617 = vmatpush1.bf16.msra.mxu0 %v6373_v8  ;;  %1648 = vmatprep.mubr.bf16.mxu0 %v7363_v14  ;;  %v6501_v8 = vld [vmem:[#allocation5 + $0x2ec] ss:$40 sps:$4 sm:$0xff]  }
  0xbb   : > { %1618 = vmatprep.subr.bf16.mxu0 %v6381_v9  ;;  %1698 = vmatprep.subr.bf16.mxu1 %v6402_v16  ;;  %v6445_v9 = vld [vmem:[#allocation5 + $0x380] ss:$40 sps:$4 sm:$0xff]  }
  0xbc   : > { %1690 = vmatmul.mubr.bf16.vlgmr.msra.gmra.mrb[0].mxu1 %v7594_v7  ;;  %v6502_v16 = vld [vmem:[#allocation5 + $0x338] ss:$40 sps:$4 sm:$0xff]  }
  0xbd   : > { %1699 = vmatpush1.bf16.msra.mxu1 %v6400_v19  ;;  %1730 = vmatprep.mubr.bf16.mxu1 %v7363_v14  ;;  %v6459_v19 = vld [vmem:[#allocation5 + $0x474] ss:$40 sps:$4 sm:$0xff]  }
  0xbe   : > { %1619 = vmatpush1.bf16.msra.mxu0 %v6379_v12  ;;  %1700 = vmatprep.subr.bf16.mxu1 %v6408_v20  ;;  %v6504_v12 = vld [vmem:[#allocation5 + $0x33c] ss:$40 sps:$4 sm:$0xff]   ;;  %v6508_v20 = vld [vmem:[#allocation5 + $0x388] ss:$40 sps:$4 sm:$0xff]  }
  0xbf   : > { %1620 = vmatprep.subr.bf16.mxu0 %v6387_v13  ;;  %v6448_v13 = vld [vmem:[#allocation5 + $0x3d0] ss:$40 sps:$4 sm:$0xff]  }
  0xc1   : > { %1701 = vmatpush1.bf16.msra.mxu1 %v6406_v23  ;;  %v6465_v23 = vld [vmem:[#allocation5 + $0x4c4] ss:$40 sps:$4 sm:$0xff]  }
  0xc2   : > { %1621 = vmatpush1.bf16.msra.mxu0 %v6385_v17  ;;  %1702 = vmatprep.subr.bf16.mxu1 %v6414_v24  ;;  %v6510_v17 = vld [vmem:[#allocation5 + $0x38c] ss:$40 sps:$4 sm:$0xff]   ;;  %v6514_v24 = vld [vmem:[#allocation5 + $0x3d8] ss:$40 sps:$4 sm:$0xff]  }
  0xc3   : > { %1622 = vmatprep.subr.bf16.mxu0 %v6393_v18  ;;  %v6451_v18 = vld [vmem:[#allocation5 + $0x420] ss:$40 sps:$4 sm:$0xff]  }
  0xc5   : > { %1703 = vmatpush1.bf16.msra.mxu1 %v6412_v28  ;;  %v6471_v28 = vld [vmem:[#allocation5 + $0x514] ss:$40 sps:$4 sm:$0xff]  }
  0xc6   : > { %1623 = vmatpush1.bf16.msra.mxu0 %v6391_v21  ;;  %1704 = vmatprep.subr.bf16.mxu1 %v6420_v29  ;;  %v6516_v21 = vld [vmem:[#allocation5 + $0x3dc] ss:$40 sps:$4 sm:$0xff]   ;;  %v6520_v29 = vld [vmem:[#allocation5 + $0x428] ss:$40 sps:$4 sm:$0xff]  }
  0xc7   : > { %1739 = vmatprep.subr.bf16.mxu0 %v6405_v22  ;;  %v6457_v22 = vld [vmem:[#allocation5 + $0x470] ss:$40 sps:$4 sm:$0xff]  }
  0xc9   : > { %5618 = vmatmul.mubr.msk.bf16.vlgmr.msra.gmra.mrb[0].mxu0 %vm1571_vm0, %v7602_v25  ;;  %1705 = vmatpush1.bf16.msra.mxu1 %v6418_v32  ;;  %v6477_v32 = vld [vmem:[#allocation5 + $0x564] ss:$40 sps:$4 sm:$0xff]  }
  0xca   : > { %1740 = vmatpush1.bf16.msra.mxu0 %v6403_v26  ;;  %1771 = vmatprep.mubr.bf16.mxu0 %v7590_v49  ;;  %v6522_v26 = vld [vmem:[#allocation5 + $0x42c] ss:$40 sps:$4 sm:$0xff]  }
  0xcb   : > { %1741 = vmatprep.subr.bf16.mxu0 %v6411_v27  ;;  %1821 = vmatprep.subr.bf16.mxu1 %v6456_v33  ;;  %v6463_v27 = vld [vmem:[#allocation5 + $0x4c0] ss:$40 sps:$4 sm:$0xff]  }
  0xcc   : > { %5619 = vmatmul.mubr.msk.bf16.vlgmr.msra.gmra.mrb[0].mxu1 %vm1571_vm0, %v7602_v25  ;;  %v6526_v33 = vld [vmem:[#allocation5 + $0x478] ss:$40 sps:$4 sm:$0xff]  }
  0xcd   : > { %1822 = vmatpush1.bf16.msra.mxu1 %v6454_v37  ;;  %1853 = vmatprep.mubr.bf16.mxu1 %v7590_v49  ;;  %v6483_v37 = vld [vmem:[#allocation5 + $0x5b4] ss:$40 sps:$4 sm:$0xff]  }
  0xce   : > { %1742 = vmatpush1.bf16.msra.mxu0 %v6409_v30  ;;  %1823 = vmatprep.subr.bf16.mxu1 %v6462_v38  ;;  %v6528_v30 = vld [vmem:[#allocation5 + $0x47c] ss:$40 sps:$4 sm:$0xff]   ;;  %v6532_v38 = vld [vmem:[#allocation5 + $0x4c8] ss:$40 sps:$4 sm:$0xff]  }
  0xcf   : > { %1743 = vmatprep.subr.bf16.mxu0 %v6417_v31  ;;  %v6469_v31 = vld [vmem:[#allocation5 + $0x510] ss:$40 sps:$4 sm:$0xff]  }
  0xd1   : > { %1824 = vmatpush1.bf16.msra.mxu1 %v6460_v41  ;;  %v6489_v41 = vld [vmem:[#allocation5 + $0x604] ss:$40 sps:$4 sm:$0xff]  }
  0xd2   : > { %1744 = vmatpush1.bf16.msra.mxu0 %v6415_v34  ;;  %1825 = vmatprep.subr.bf16.mxu1 %v6468_v42  ;;  %v6534_v34 = vld [vmem:[#allocation5 + $0x4cc] ss:$40 sps:$4 sm:$0xff]   ;;  %v6538_v42 = vld [vmem:[#allocation5 + $0x518] ss:$40 sps:$4 sm:$0xff]  }
  0xd3   : > { %1745 = vmatprep.subr.bf16.mxu0 %v6423_v35  ;;  %v6475_v35 = vld [vmem:[#allocation5 + $0x560] ss:$40 sps:$4 sm:$0xff]  }
  0xd5   : > { %1826 = vmatpush1.bf16.msra.mxu1 %v6466_v45  ;;  %v6507_v45 = vld [vmem:[#allocation5 + $0x24] ss:$40 sps:$4 sm:$0xff]  }
  0xd6   : > { %1746 = vmatpush1.bf16.msra.mxu0 %v6421_v39  ;;  %1827 = vmatprep.subr.bf16.mxu1 %v6474_v46  ;;  %v6540_v39 = vld [vmem:[#allocation5 + $0x51c] ss:$40 sps:$4 sm:$0xff]   ;;  %v6544_v46 = vld [vmem:[#allocation5 + $0x568] ss:$40 sps:$4 sm:$0xff]  }
  0xd7   : > { %1747 = vmatprep.subr.bf16.mxu0 %v6426_v40  ;;  %v6481_v40 = vld [vmem:[#allocation5 + $0x5b0] ss:$40 sps:$4 sm:$0xff]  }
  0xd9   : > { %1828 = vmatpush1.bf16.msra.mxu1 %v6472_v50  ;;  %v6513_v50 = vld [vmem:[#allocation5 + $0x74] ss:$40 sps:$4 sm:$0xff]  }
  0xda   : > { %1748 = vmatpush1.bf16.msra.mxu0 %v6424_v43  ;;  %1829 = vmatprep.subr.bf16.mxu1 %v6480_v51  ;;  %v6487_v43 = vld [vmem:[#allocation5 + $0x600] ss:$40 sps:$4 sm:$0xff]  }
  0xdb   : > { %1749 = vmatprep.subr.bf16.mxu0 %v6429_v44  ;;  %v6546_v44 = vld [vmem:[#allocation5 + $0x56c] ss:$40 sps:$4 sm:$0xff]   ;;  %v6550_v51 = vld [vmem:[#allocation5 + $0x5b8] ss:$40 sps:$4 sm:$0xff]  }
  0xdd   : > { %1830 = vmatpush1.bf16.msra.mxu1 %v6478_v54  ;;  %v6519_v54 = vld [vmem:[#allocation5 + $0xc4] ss:$40 sps:$4 sm:$0xff]  }
  0xde   : > { %1750 = vmatpush1.bf16.msra.mxu0 %v6427_v47  ;;  %1831 = vmatprep.subr.bf16.mxu1 %v6486_v55  ;;  %v6552_v47 = vld [vmem:[#allocation5 + $0x5bc] ss:$40 sps:$4 sm:$0xff]   ;;  %v6556_v55 = vld [vmem:[#allocation5 + $0x608] ss:$40 sps:$4 sm:$0xff]  }
  0xdf   : > { %1751 = vmatprep.subr.bf16.mxu0 %v6432_v48  ;;  %v6505_v48 = vld [vmem:[#allocation5 + $0x20] ss:$40 sps:$4 sm:$0xff]  }
  0xe1   : > { %1832 = vmatpush1.bf16.msra.mxu1 %v6484_v58  ;;  %v6525_v58 = vld [vmem:[#allocation5 + $0x114] ss:$40 sps:$4 sm:$0xff]  }
  0xe2   : > { %1752 = vmatpush1.bf16.msra.mxu0 %v6430_v52  ;;  %1833 = vmatprep.subr.bf16.mxu1 %v6492_v59  ;;  %v6558_v52 = vld [vmem:[#allocation5 + $0x60c] ss:$40 sps:$4 sm:$0xff]  }
  0xe3   : > { %1753 = vmatprep.subr.bf16.mxu0 %v6435_v53  ;;  %v6511_v53 = vld [vmem:[#allocation5 + $0x70] ss:$40 sps:$4 sm:$0xff]   ;;  %v6592_v59 = vld [vmem:[%s7581_s9] ss:$20 sps:$4 sm:$0xff]  }
  0xe5   : > { %1834 = vmatpush1.bf16.msra.mxu1 %v6490_v62  ;;  %v6531_v62 = vld [vmem:[#allocation5 + $0x164] ss:$40 sps:$4 sm:$0xff]  }
  0xe6   : > { %1754 = vmatpush1.bf16.msra.mxu0 %v6433_v56  ;;  %1835 = vmatprep.subr.bf16.mxu1 %v6495_v63  ;;  %v6517_v56 = vld [vmem:[#allocation5 + $0xc0] ss:$40 sps:$4 sm:$0xff]  }
  0xe7   : > { %1755 = vmatprep.subr.bf16.mxu0 %v6438_v57  ;;  %v6594_v57 = vld [vmem:[%s7581_s9 + $0x4] ss:$20 sps:$4 sm:$0xff]   ;;  %v6598_v63 = vld [vmem:[%s7581_s9 + $0x28] ss:$20 sps:$4 sm:$0xff]  }
  0xe9   : > { %1836 = vmatpush1.bf16.msra.mxu1 %v6493_v2  ;;  %v6604_v2 = vld [vmem:[%s7581_s9 + $0x50] ss:$20 sps:$4 sm:$0xff]  }
  0xea   : > { %1756 = vmatpush1.bf16.msra.mxu0 %v6436_v60  ;;  %1837 = vmatprep.subr.bf16.mxu1 %v6498_v3  ;;  %v6523_v60 = vld [vmem:[#allocation5 + $0x110] ss:$40 sps:$4 sm:$0xff]  }
  0xeb   : > { %1757 = vmatprep.subr.bf16.mxu0 %v6441_v61  ;;  %v6600_v61 = vld [vmem:[%s7581_s9 + $0x2c] ss:$20 sps:$4 sm:$0xff]   ;;  %v6535_v3 = vld [vmem:[#allocation5 + $0x1b0] ss:$40 sps:$4 sm:$0xff]  }
  0xed   : > { %1838 = vmatpush1.bf16.msra.mxu1 %v6496_v6  ;;  %v6610_v6 = vld [vmem:[%s7581_s9 + $0x78] ss:$20 sps:$4 sm:$0xff]  }
  0xee   : > { %1758 = vmatpush1.bf16.msra.mxu0 %v6439_v0  ;;  %1839 = vmatprep.subr.bf16.mxu1 %v6501_v8  ;;  %v6606_v0 = vld [vmem:[%s7581_s9 + $0x54] ss:$20 sps:$4 sm:$0xff]  }
  0xef   : > { %1759 = vmatprep.subr.bf16.mxu0 %v6444_v1  ;;  %v6537_v1 = vld [vmem:[#allocation5 + $0x1b4] ss:$40 sps:$4 sm:$0xff]   ;;  %v6541_v8 = vld [vmem:[#allocation5 + $0x200] ss:$40 sps:$4 sm:$0xff]  }
  0xf1   : > { %1840 = vmatpush1.bf16.msra.mxu1 %v6499_v11  ;;  %v6616_v11 = vld [vmem:[%s7581_s9 + $0xa0] ss:$20 sps:$4 sm:$0xff]  }
  0xf2   : > { %1760 = vmatpush1.bf16.msra.mxu0 %v6442_v4  ;;  %1841 = vmatprep.subr.bf16.mxu1 %v6504_v12  ;;  %v6612_v4 = vld [vmem:[%s7581_s9 + $0x7c] ss:$20 sps:$4 sm:$0xff]  }
  0xf3   : > { %1761 = vmatprep.subr.bf16.mxu0 %v6447_v5  ;;  %v6543_v5 = vld [vmem:[#allocation5 + $0x204] ss:$40 sps:$4 sm:$0xff]   ;;  %v6547_v12 = vld [vmem:[#allocation5 + $0x250] ss:$40 sps:$4 sm:$0xff]  }
  0xf5   : > { %1842 = vmatpush1.bf16.msra.mxu1 %v6502_v16  ;;  %v6622_v16 = vld [vmem:[%s7581_s9 + $0xc8] ss:$20 sps:$4 sm:$0xff]  }
  0xf6   : > { %1762 = vmatpush1.bf16.msra.mxu0 %v6445_v9  ;;  %1843 = vmatprep.subr.bf16.mxu1 %v6510_v17  ;;  %v6618_v9 = vld [vmem:[%s7581_s9 + $0xa4] ss:$20 sps:$4 sm:$0xff]   ;;  %v6553_v17 = vld [vmem:[#allocation5 + $0x2a0] ss:$40 sps:$4 sm:$0xff]  }
  0xf7   : > { %1763 = vmatprep.subr.bf16.mxu0 %v6450_v10  ;;  %v6549_v10 = vld [vmem:[#allocation5 + $0x254] ss:$40 sps:$4 sm:$0xff]  }
  0xf9   : > { %1844 = vmatpush1.bf16.msra.mxu1 %v6508_v20  ;;  %v6628_v20 = vld [vmem:[%s7581_s9 + $0xf0] ss:$20 sps:$4 sm:$0xff]  }
  0xfa   : > { %1764 = vmatpush1.bf16.msra.mxu0 %v6448_v13  ;;  %1845 = vmatprep.subr.bf16.mxu1 %v6516_v21  ;;  %v6624_v13 = vld [vmem:[%s7581_s9 + $0xcc] ss:$20 sps:$4 sm:$0xff]   ;;  %v6559_v21 = vld [vmem:[#allocation5 + $0x2f0] ss:$40 sps:$4 sm:$0xff]  }
  0xfb   : > { %1765 = vmatprep.subr.bf16.mxu0 %v6453_v15  ;;  %v6555_v15 = vld [vmem:[#allocation5 + $0x2a4] ss:$40 sps:$4 sm:$0xff]  }
  0xfd   : > { %1846 = vmatpush1.bf16.msra.mxu1 %v6514_v24  ;;  %v6634_v24 = vld [vmem:[%s7581_s9 + $0x118] ss:$20 sps:$4 sm:$0xff]  }
  0xfe   : > { %1766 = vmatpush1.bf16.msra.mxu0 %v6451_v18  ;;  %1847 = vmatprep.subr.bf16.mxu1 %v6522_v26  ;;  %v6630_v18 = vld [vmem:[%s7581_s9 + $0xf4] ss:$20 sps:$4 sm:$0xff]  }
  0xff   : > { %1767 = vmatprep.subr.bf16.mxu0 %v6459_v19  ;;  %v6561_v19 = vld [vmem:[#allocation5 + $0x2f4] ss:$40 sps:$4 sm:$0xff]   ;;  %v6562_v26 = vld [vmem:[#allocation5 + $0x340] ss:$40 sps:$4 sm:$0xff]  }
 0x101   : > { %1848 = vmatpush1.bf16.msra.mxu1 %v6520_v29  ;;  %v6640_v29 = vld [vmem:[%s7581_s9 + $0x140] ss:$20 sps:$4 sm:$0xff]  }
 0x102   : > { %1768 = vmatpush1.bf16.msra.mxu0 %v6457_v22  ;;  %1849 = vmatprep.subr.bf16.mxu1 %v6528_v30  ;;  %v6636_v22 = vld [vmem:[%s7581_s9 + $0x11c] ss:$20 sps:$4 sm:$0xff]   ;;  %v6648_v30 = vld [vmem:[%s7581_s9 + $0x16c] ss:$20 sps:$4 sm:$0xff]  }
 0x103   : > { %1769 = vmatprep.subr.bf16.mxu0 %v6465_v23  ;;  %v6564_v23 = vld [vmem:[#allocation5 + $0x344] ss:$40 sps:$4 sm:$0xff]  }
 0x105   : > { %1850 = vmatpush1.bf16.msra.mxu1 %v6526_v33  ;;  %v6646_v33 = vld [vmem:[%s7581_s9 + $0x168] ss:$20 sps:$4 sm:$0xff]  }
 0x106   : > { %1770 = vmatpush1.bf16.msra.mxu0 %v6463_v27  ;;  %1851 = vmatprep.subr.bf16.mxu1 %v6534_v34  ;;  %v6642_v27 = vld [vmem:[%s7581_s9 + $0x144] ss:$20 sps:$4 sm:$0xff]   ;;  %v6654_v34 = vld [vmem:[%s7581_s9 + $0x194] ss:$20 sps:$4 sm:$0xff]  }
 0x107   : > { %1780 = vmatprep.subr.bf16.mxu0 %v6471_v28  ;;  %v6567_v28 = vld [vmem:[#allocation5 + $0x394] ss:$40 sps:$4 sm:$0xff]  }
 0x109   : > { %1772 = vmatmul.mubr.bf16.vlgmr.msra.gmra.mrb[4].mxu0 %v7594_v7  ;;  %1852 = vmatpush1.bf16.msra.mxu1 %v6532_v38  ;;  %v6652_v38 = vld [vmem:[%s7581_s9 + $0x190] ss:$20 sps:$4 sm:$0xff]  }
 0x10a   : > { %1781 = vmatpush1.bf16.msra.mxu0 %v6469_v31  ;;  %1812 = vmatprep.mubr.bf16.mxu0 %v7363_v14  ;;  %v6565_v31 = vld [vmem:[#allocation5 + $0x390] ss:$40 sps:$4 sm:$0xff]  }
 0x10b   : > { %1782 = vmatprep.subr.bf16.mxu0 %v6477_v32  ;;  %1862 = vmatprep.subr.bf16.mxu1 %v6540_v39  ;;  %v6570_v32 = vld [vmem:[#allocation5 + $0x3e4] ss:$40 sps:$4 sm:$0xff]   ;;  %v6571_v39 = vld [vmem:[#allocation5 + $0x430] ss:$40 sps:$4 sm:$0xff]  }
 0x10c   : > { %1854 = vmatmul.mubr.bf16.vlgmr.msra.gmra.mrb[4].mxu1 %v7594_v7 }
 0x10d   : > { %1863 = vmatpush1.bf16.msra.mxu1 %v6538_v42  ;;  %1894 = vmatprep.mubr.bf16.mxu1 %v7363_v14  ;;  %v6658_v42 = vld [vmem:[%s7581_s9 + $0x1b8] ss:$20 sps:$4 sm:$0xff]  }
 0x10e   : > { %1783 = vmatpush1.bf16.msra.mxu0 %v6475_v35  ;;  %1864 = vmatprep.subr.bf16.mxu1 %v6546_v44  ;;  %v6568_v35 = vld [vmem:[#allocation5 + $0x3e0] ss:$40 sps:$4 sm:$0xff]   ;;  %v6666_v44 = vld [vmem:[%s7581_s9 + $0x1e4] ss:$20 sps:$4 sm:$0xff]  }
 0x10f   : > { %1784 = vmatprep.subr.bf16.mxu0 %v6483_v37  ;;  %v6573_v37 = vld [vmem:[#allocation5 + $0x434] ss:$40 sps:$4 sm:$0xff]  }
 0x111   : > { %1865 = vmatpush1.bf16.msra.mxu1 %v6544_v46  ;;  %v6664_v46 = vld [vmem:[%s7581_s9 + $0x1e0] ss:$20 sps:$4 sm:$0xff]  }
 0x112   : > { %1785 = vmatpush1.bf16.msra.mxu0 %v6481_v40  ;;  %1866 = vmatprep.subr.bf16.mxu1 %v6552_v47  ;;  %v6660_v40 = vld [vmem:[%s7581_s9 + $0x1bc] ss:$20 sps:$4 sm:$0xff]  }
 0x113   : > { %1786 = vmatprep.subr.bf16.mxu0 %v6489_v41  ;;  %v6576_v41 = vld [vmem:[#allocation5 + $0x484] ss:$40 sps:$4 sm:$0xff]   ;;  %v6577_v47 = vld [vmem:[#allocation5 + $0x4d0] ss:$40 sps:$4 sm:$0xff]  }
 0x115   : > { %1867 = vmatpush1.bf16.msra.mxu1 %v6550_v51  ;;  %v6670_v51 = vld [vmem:[%s7581_s9 + $0x208] ss:$20 sps:$4 sm:$0xff]  }
 0x116   : > { %1787 = vmatpush1.bf16.msra.mxu0 %v6487_v43  ;;  %1868 = vmatprep.subr.bf16.mxu1 %v6558_v52  ;;  %v6574_v43 = vld [vmem:[#allocation5 + $0x480] ss:$40 sps:$4 sm:$0xff]  }
 0x117   : > { %1903 = vmatprep.subr.bf16.mxu0 %v6507_v45  ;;  %v6579_v45 = vld [vmem:[#allocation5 + $0x4d4] ss:$40 sps:$4 sm:$0xff]   ;;  %v6580_v52 = vld [vmem:[#allocation5 + $0x520] ss:$40 sps:$4 sm:$0xff]  }
 0x119   : > { %5620 = vmatmul.mubr.msk.bf16.vlgmr.msra.gmra.mrb[4].mxu0 %vm1571_vm0, %v7602_v25  ;;  %1869 = vmatpush1.bf16.msra.mxu1 %v6556_v55  ;;  %v6676_v55 = vld [vmem:[%s7581_s9 + $0x230] ss:$20 sps:$4 sm:$0xff]  }
 0x11a   : > { %1904 = vmatpush1.bf16.msra.mxu0 %v6505_v48  ;;  %1935 = vmatprep.mubr.bf16.mxu0 %v7590_v49  ;;  %v6529_v49 = vld [vmem:[#allocation5 + $0x160] ss:$40 sps:$4 sm:$0xff]  }
 0x11b   : > { %1905 = vmatprep.subr.bf16.mxu0 %v6513_v50  ;;  %4652 = vmatprep.subr.bf16.mxu1 %v6594_v57  ;;  %v6672_v48 = vld [vmem:[%s7581_s9 + $0x20c] ss:$20 sps:$4 sm:$0xff]   ;;  %v6684_v57 = vld [vmem:[%s7581_s9 + $0x25c] ss:$20 sps:$4 sm:$0xff]  }
 0x11c   : > { %5621 = vmatmul.mubr.msk.bf16.vlgmr.msra.gmra.mrb[4].mxu1 %vm1571_vm0, %v7602_v25  ;;  %v6582_v50 = vld [vmem:[#allocation5 + $0x524] ss:$40 sps:$4 sm:$0xff]  }
 0x11d   : > { %4653 = vmatpush1.bf16.msra.mxu1 %v6592_v59  ;;  %v6682_v59 = vld [vmem:[%s7581_s9 + $0x258] ss:$20 sps:$4 sm:$0xff]  }
 0x11e   : > { %1906 = vmatpush1.bf16.msra.mxu0 %v6511_v53  ;;  %4654 = vmatprep.subr.bf16.mxu1 %v6600_v61  ;;  %v6678_v53 = vld [vmem:[%s7581_s9 + $0x234] ss:$20 sps:$4 sm:$0xff]  }
 0x11f   : > { %1907 = vmatprep.subr.bf16.mxu0 %v6519_v54  ;;  %v6585_v54 = vld [vmem:[#allocation5 + $0x574] ss:$40 sps:$4 sm:$0xff]   ;;  %v6586_v61 = vld [vmem:[#allocation5 + $0x5c0] ss:$40 sps:$4 sm:$0xff]  }
 0x121   : > { %4655 = vmatpush1.bf16.msra.mxu1 %v6598_v63  ;;  %v6597_v63 = vld [vmem:[%s7581_s9 + $0xc] ss:$20 sps:$4 sm:$0xff]  }
 0x122   : > { %1908 = vmatpush1.bf16.msra.mxu0 %v6517_v56  ;;  %4656 = vmatprep.subr.bf16.mxu1 %v6606_v0  ;;  %v6583_v56 = vld [vmem:[#allocation5 + $0x570] ss:$40 sps:$4 sm:$0xff]  }
 0x123   : > { %1909 = vmatprep.subr.bf16.mxu0 %v6525_v58  ;;  %v6588_v58 = vld [vmem:[#allocation5 + $0x5c4] ss:$40 sps:$4 sm:$0xff]  }
 0x124   : > { %v6601_v0 = vld [vmem:[%s7581_s9 + $0x30] ss:$20 sps:$4 sm:$0xff]  }
 0x125   : > { %4657 = vmatpush1.bf16.msra.mxu1 %v6604_v2  ;;  %v6607_v2 = vld [vmem:[%s7581_s9 + $0x58] ss:$20 sps:$4 sm:$0xff]  }
 0x126   : > { %1910 = vmatpush1.bf16.msra.mxu0 %v6523_v60  ;;  %4658 = vmatprep.subr.bf16.mxu1 %v6612_v4  ;;  %v6690_v60 = vld [vmem:[%s7581_s9 + $0x284] ss:$20 sps:$4 sm:$0xff]   ;;  %v6613_v4 = vld [vmem:[%s7581_s9 + $0x80] ss:$20 sps:$4 sm:$0xff]  }
 0x127   : > { %1911 = vmatprep.subr.bf16.mxu0 %v6531_v62  ;;  %v6591_v62 = vld [vmem:[#allocation5 + $0x614] ss:$40 sps:$4 sm:$0xff]  }
 0x129   : > { %4659 = vmatpush1.bf16.msra.mxu1 %v6610_v6  ;;  %v6627_v6 = vld [vmem:[%s7581_s9 + $0xd4] ss:$20 sps:$4 sm:$0xff]  }
 0x12a   : > { %1912 = vmatpush1.bf16.msra.mxu0 %v6529_v49  ;;  %4660 = vmatprep.subr.bf16.mxu1 %v6618_v9  ;;  %v6603_v49 = vld [vmem:[%s7581_s9 + $0x34] ss:$20 sps:$4 sm:$0xff]   ;;  %v6633_v9 = vld [vmem:[%s7581_s9 + $0xfc] ss:$20 sps:$4 sm:$0xff]  }
 0x12b   : > { %1913 = vmatprep.subr.bf16.mxu0 %v6537_v1  ;;  %v6609_v1 = vld [vmem:[%s7581_s9 + $0x5c] ss:$20 sps:$4 sm:$0xff]  }
 0x12d   : > { %4661 = vmatpush1.bf16.msra.mxu1 %v6616_v11  ;;  %v6639_v11 = vld [vmem:[%s7581_s9 + $0x124] ss:$20 sps:$4 sm:$0xff]  }
 0x12e   : > { %1914 = vmatpush1.bf16.msra.mxu0 %v6535_v3  ;;  %4662 = vmatprep.subr.bf16.mxu1 %v6624_v13  ;;  %v6615_v3 = vld [vmem:[%s7581_s9 + $0x84] ss:$20 sps:$4 sm:$0xff]   ;;  %v6645_v13 = vld [vmem:[%s7581_s9 + $0x14c] ss:$20 sps:$4 sm:$0xff]  }
 0x12f   : > { %1915 = vmatprep.subr.bf16.mxu0 %v6543_v5  ;;  %v6621_v5 = vld [vmem:[%s7581_s9 + $0xac] ss:$20 sps:$4 sm:$0xff]  }
 0x131   : > { %4663 = vmatpush1.bf16.msra.mxu1 %v6622_v16  ;;  %v6651_v16 = vld [vmem:[%s7581_s9 + $0x174] ss:$20 sps:$4 sm:$0xff]  }
 0x132   : > { %1916 = vmatpush1.bf16.msra.mxu0 %v6541_v8  ;;  %4664 = vmatprep.subr.bf16.mxu1 %v6630_v18  ;;  %v6625_v8 = vld [vmem:[%s7581_s9 + $0xd0] ss:$20 sps:$4 sm:$0xff]  }
 0x133   : > { %1917 = vmatprep.subr.bf16.mxu0 %v6549_v10  ;;  %v6631_v10 = vld [vmem:[%s7581_s9 + $0xf8] ss:$20 sps:$4 sm:$0xff]   ;;  %v6657_v18 = vld [vmem:[%s7581_s9 + $0x19c] ss:$20 sps:$4 sm:$0xff]  }
 0x135   : > { %4665 = vmatpush1.bf16.msra.mxu1 %v6628_v20  ;;  %v6663_v20 = vld [vmem:[%s7581_s9 + $0x1c4] ss:$20 sps:$4 sm:$0xff]  }
 0x136   : > { %1918 = vmatpush1.bf16.msra.mxu0 %v6547_v12  ;;  %4666 = vmatprep.subr.bf16.mxu1 %v6636_v22  ;;  %v6637_v12 = vld [vmem:[%s7581_s9 + $0x120] ss:$20 sps:$4 sm:$0xff]  }
 0x137   : > { %1919 = vmatprep.subr.bf16.mxu0 %v6555_v15  ;;  %v6643_v15 = vld [vmem:[%s7581_s9 + $0x148] ss:$20 sps:$4 sm:$0xff]   ;;  %v6669_v22 = vld [vmem:[%s7581_s9 + $0x1ec] ss:$20 sps:$4 sm:$0xff]  }
 0x139   : > { %4667 = vmatpush1.bf16.msra.mxu1 %v6634_v24  ;;  %v7687_v24 = vsub.s32 0, %v7587_v36 }
 0x13a   : > { %1920 = vmatpush1.bf16.msra.mxu0 %v6553_v17  ;;  %4668 = vmatprep.subr.bf16.mxu1 %v6642_v27  ;;  %v6649_v17 = vld [vmem:[%s7581_s9 + $0x170] ss:$20 sps:$4 sm:$0xff]   ;;  %v6675_v27 = vld [vmem:[%s7581_s9 + $0x214] ss:$20 sps:$4 sm:$0xff]  }
 0x13b   : > { %1921 = vmatprep.subr.bf16.mxu0 %v6561_v19  ;;  %v6655_v19 = vld [vmem:[%s7581_s9 + $0x198] ss:$20 sps:$4 sm:$0xff]  }
 0x13d   : > { %4669 = vmatpush1.bf16.msra.mxu1 %v6640_v29 }
 0x13e   : > { %1922 = vmatpush1.bf16.msra.mxu0 %v6559_v21  ;;  %4670 = vmatprep.subr.bf16.mxu1 %v6648_v30  ;;  %v6661_v21 = vld [vmem:[%s7581_s9 + $0x1c0] ss:$20 sps:$4 sm:$0xff]   ;;  %v6673_v30 = vld [vmem:[%s7581_s9 + $0x210] ss:$20 sps:$4 sm:$0xff]  }
 0x13f   : > { %1923 = vmatprep.subr.bf16.mxu0 %v6564_v23  ;;  %v7684_v23 = vld [vmem:[%s8229_s2] sm:$0xff] }
 0x140   : > { %v498_v29 = vrot.slane %v7684_v23, %v7687_v24 }
 0x141   : > { %4671 = vmatpush1.bf16.msra.mxu1 %v6646_v33 }
 0x142   : > { %1924 = vmatpush1.bf16.msra.mxu0 %v6562_v26  ;;  %4672 = vmatprep.subr.bf16.mxu1 %v6654_v34  ;;  %v6667_v26 = vld [vmem:[%s7581_s9 + $0x1e8] ss:$20 sps:$4 sm:$0xff]  }
 0x143   : > { %1925 = vmatprep.subr.bf16.mxu0 %v6567_v28  ;;  %v7692_v28 = vsub.s32 1, %v7587_v36 }
 0x145   : > { %4673 = vmatpush1.bf16.msra.mxu1 %v6652_v38  ;;  %v6687_v38 = vld [vmem:[%s7581_s9 + $0x264] ss:$20 sps:$4 sm:$0xff]  }
 0x146   : > { %1926 = vmatpush1.bf16.msra.mxu0 %v6565_v31  ;;  %4674 = vmatprep.subr.bf16.mxu1 %v6660_v40  ;;  %v6681_v31 = vld [vmem:[%s7581_s9 + $0x23c] ss:$20 sps:$4 sm:$0xff]  }
 0x147   : > { %1927 = vmatprep.subr.bf16.mxu0 %v6570_v32  ;;  %v502_v32 = vrot.slane %v7684_v23, %v7692_v28 }
 0x149   : > { %4675 = vmatpush1.bf16.msra.mxu1 %v6658_v42 }
 0x14a   : > { %1928 = vmatpush1.bf16.msra.mxu0 %v6568_v35  ;;  %4676 = vmatprep.subr.bf16.mxu1 %v6666_v44 }
 0x14b   : > { %1929 = vmatprep.subr.bf16.mxu0 %v6573_v37  ;;  %v6679_v37 = vld [vmem:[%s7581_s9 + $0x238] ss:$20 sps:$4 sm:$0xff]  }
 0x14d   : > { %4677 = vmatpush1.bf16.msra.mxu1 %v6664_v46  ;;  %v6693_v46 = vld [vmem:[%s7581_s9 + $0x28c] ss:$20 sps:$4 sm:$0xff]  }
 0x14e   : > { %1930 = vmatpush1.bf16.msra.mxu0 %v6571_v39  ;;  %4678 = vmatprep.subr.bf16.mxu1 %v6672_v48 }
 0x14f   : > { %1931 = vmatprep.subr.bf16.mxu0 %v6576_v41 }
 0x151   : > { %4679 = vmatpush1.bf16.msra.mxu1 %v6670_v51 }
 0x152   : > { %1932 = vmatpush1.bf16.msra.mxu0 %v6574_v43  ;;  %4680 = vmatprep.subr.bf16.mxu1 %v6678_v53  ;;  %v509_v43 = vsub.s32 3, %v7587_v36 }
 0x153   : > { %1933 = vmatprep.subr.bf16.mxu0 %v6579_v45  ;;  %v6685_v45 = vld [vmem:[%s7581_s9 + $0x260] ss:$20 sps:$4 sm:$0xff]  }
 0x155   : > { %4681 = vmatpush1.bf16.msra.mxu1 %v6676_v55 }
 0x156   : > { %1934 = vmatpush1.bf16.msra.mxu0 %v6577_v47  ;;  %4682 = vmatprep.subr.bf16.mxu1 %v6684_v57  ;;  %v510_v47 = vrot.slane %v7684_v23, %v509_v43 }
 0x157   : > { %1944 = vmatprep.subr.bf16.mxu0 %v6582_v50 }
 0x159   : > { %1936 = vmatmul.mubr.bf16.vlgmr.msra.gmra.mrb[8].mxu0 %v7594_v7  ;;  %4683 = vmatpush1.bf16.msra.mxu1 %v6682_v59  ;;  %v6589_v7 = vld [vmem:[#allocation5 + $0x610] ss:$40 sps:$4 sm:$0xff]  }
 0x15a   : > { %1945 = vmatpush1.bf16.msra.mxu0 %v6580_v52  ;;  %1976 = vmatprep.mubr.bf16.mxu0 %v7363_v14  ;;  %v6595_v14 = vld [vmem:[%s7581_s9 + $0x8] ss:$20 sps:$4 sm:$0xff]  }
 0x15b   : > { %1946 = vmatprep.subr.bf16.mxu0 %v6585_v54  ;;  %4693 = vmatprep.subr.bf16.mxu1 %v6690_v60 }
 0x15e   : > { %1947 = vmatpush1.bf16.msra.mxu0 %v6583_v56 }
 0x15f   : > { %1948 = vmatprep.subr.bf16.mxu0 %v6588_v58 }
 0x162   : > { %1949 = vmatpush1.bf16.msra.mxu0 %v6586_v61 }
 0x163   : > { %1950 = vmatprep.subr.bf16.mxu0 %v6591_v62 }
 0x166   : > { %1951 = vmatpush1.bf16.msra.mxu0 %v6589_v7 }
 0x167   : > { %4857 = vmatprep.subr.bf16.mxu0 %v6597_v63 }
 0x169   : > { %5622 = vmatmul.mubr.msk.bf16.vlgmr.msra.gmra.mrb[8].mxu0 %vm1571_vm0, %v7602_v25  ;;  %v6619_v25 = vld [vmem:[%s7581_s9 + $0xa8] ss:$20 sps:$4 sm:$0xff]  }
 0x16a   : > { %4858 = vmatpush1.bf16.msra.mxu0 %v6595_v14  ;;  %v6688_v14 = vld [vmem:[%s7581_s9 + $0x280] ss:$20 sps:$4 sm:$0xff]  }
 0x16b   : > { %4859 = vmatprep.subr.bf16.mxu0 %v6603_v49  ;;  %v6691_v49 = vld [vmem:[%s7581_s9 + $0x288] ss:$20 sps:$4 sm:$0xff]  }
 0x16e   : > { %4860 = vmatpush1.bf16.msra.mxu0 %v6601_v0 }
 0x16f   : > { %4861 = vmatprep.subr.bf16.mxu0 %v6609_v1 }
 0x172   : > { %4862 = vmatpush1.bf16.msra.mxu0 %v6607_v2  ;;  %v6696_v2 = vld [vmem:[%s7581_s9 + $0x2ac] ss:$20 sps:$4 sm:$0xff]  }
 0x173   : > { %4863 = vmatprep.subr.bf16.mxu0 %v6615_v3  ;;  %v6699_v3 = vld [vmem:[%s7581_s9 + $0x2b4] ss:$20 sps:$4 sm:$0xff]  }
 0x176   : > { %4864 = vmatpush1.bf16.msra.mxu0 %v6613_v4  ;;  %v505_v4 = vsub.s32 2, %v7587_v36 }
 0x177   : > { %4865 = vmatprep.subr.bf16.mxu0 %v6621_v5  ;;  %v6694_v5 = vld [vmem:[%s7581_s9 + $0x2a8] ss:$20 sps:$4 sm:$0xff]  }
 0x17a   : > { %4866 = vmatpush1.bf16.msra.mxu0 %v6619_v25  ;;  %v6697_v25 = vld [vmem:[%s7581_s9 + $0x2b0] ss:$20 sps:$4 sm:$0xff]  }
 0x17b   : > { %4867 = vmatprep.subr.bf16.mxu0 %v6627_v6  ;;  %v6702_v6 = vld [vmem:[%s7581_s9 + $0x2d4] ss:$20 sps:$4 sm:$0xff]  }
 0x17e   : > { %4868 = vmatpush1.bf16.msra.mxu0 %v6625_v8  ;;  %v6705_v8 = vld [vmem:[%s7581_s9 + $0x2dc] ss:$20 sps:$4 sm:$0xff]  }
 0x17f   : > { %4869 = vmatprep.subr.bf16.mxu0 %v6633_v9 }
 0x182   : > { %4870 = vmatpush1.bf16.msra.mxu0 %v6631_v10 }
 0x183   : > { %4871 = vmatprep.subr.bf16.mxu0 %v6639_v11  ;;  %v6700_v11 = vld [vmem:[%s7581_s9 + $0x2d0] ss:$20 sps:$4 sm:$0xff]  }
 0x186   : > { %4872 = vmatpush1.bf16.msra.mxu0 %v6637_v12  ;;  %v6703_v12 = vld [vmem:[%s7581_s9 + $0x2d8] ss:$20 sps:$4 sm:$0xff]  }
 0x187   : > { %4873 = vmatprep.subr.bf16.mxu0 %v6645_v13 }
 0x18a   : > { %4874 = vmatpush1.bf16.msra.mxu0 %v6643_v15  ;;  %v6708_v15 = vld [vmem:[%s7581_s9 + $0x2fc] ss:$20 sps:$4 sm:$0xff]  }
 0x18b   : > { %4875 = vmatprep.subr.bf16.mxu0 %v6651_v16  ;;  %v6711_v16 = vld [vmem:[%s7581_s9 + $0x304] ss:$20 sps:$4 sm:$0xff]  }
 0x18e   : > { %4876 = vmatpush1.bf16.msra.mxu0 %v6649_v17  ;;  %v6706_v17 = vld [vmem:[%s7581_s9 + $0x2f8] ss:$20 sps:$4 sm:$0xff]  }
 0x18f   : > { %4877 = vmatprep.subr.bf16.mxu0 %v6657_v18  ;;  %v6709_v18 = vld [vmem:[%s7581_s9 + $0x300] ss:$20 sps:$4 sm:$0xff]  }
 0x192   : > { %4878 = vmatpush1.bf16.msra.mxu0 %v6655_v19  ;;  %v6714_v19 = vld [vmem:[%s7581_s9 + $0x324] ss:$20 sps:$4 sm:$0xff]  }
 0x193   : > { %4879 = vmatprep.subr.bf16.mxu0 %v6663_v20  ;;  %v6717_v20 = vld [vmem:[%s7581_s9 + $0x32c] ss:$20 sps:$4 sm:$0xff]  }
 0x196   : > { %4880 = vmatpush1.bf16.msra.mxu0 %v6661_v21  ;;  %v6712_v21 = vld [vmem:[%s7581_s9 + $0x320] ss:$20 sps:$4 sm:$0xff]  }
 0x197   : > { %4881 = vmatprep.subr.bf16.mxu0 %v6669_v22  ;;  %v6715_v22 = vld [vmem:[%s7581_s9 + $0x328] ss:$20 sps:$4 sm:$0xff]  }
 0x19a   : > { %4882 = vmatpush1.bf16.msra.mxu0 %v6667_v26  ;;  %v506_v26 = vrot.slane %v7684_v23, %v505_v4 }
 0x19b   : > { %4883 = vmatprep.subr.bf16.mxu0 %v6675_v27  ;;  %v6720_v27 = vld [vmem:[%s7581_s9 + $0x34c] ss:$20 sps:$4 sm:$0xff]  }
 0x19c   : > { %v1650_v33 = vpop.f32.mrb[0].mxu0 }
 0x19d   : > { %v6149_v34 = vadd.f32 %v1650_v33, %v498_v29  ;;  %v1652_v35 = vpop.f32.mrb[1].mxu0  ;;  %v6723_v29 = vld [vmem:[%s7581_s9 + $0x354] ss:$20 sps:$4 sm:$0xff]  }
 0x19e   : > { %v6150_v39 = vadd.f32 %v1652_v35, %v502_v32  ;;  %v1654_v40 = vpop.f32.mrb[2].mxu0  ;;  %4884 = vmatpush1.bf16.msra.mxu0 %v6673_v30  ;;  %v6718_v30 = vld [vmem:[%s7581_s9 + $0x348] ss:$20 sps:$4 sm:$0xff]   ;;  %v6724_v35 = vld [vmem:[%s7581_s9 + $0x370] ss:$20 sps:$4 sm:$0xff]  }
 0x19f   : > { %v5623_v41 = vmul.f32 -1.442695, %v6149_v34  ;;  %v1655_v42 = vpop.f32.mrb[3].mxu0  ;;  %4885 = vmatprep.subr.bf16.mxu0 %v6681_v31  ;;  %v7708_v48 = vpop.f32.mrb[0].mxu1  ;;  %v6721_v31 = vld [vmem:[%s7581_s9 + $0x350] ss:$20 sps:$4 sm:$0xff]  }
 0x1a0   : > { %v5624_v44 = vmul.f32 -1.442695, %v6150_v39  ;;  %v1734_v50 = vpop.f32.mrb[1].mxu1  ;;  %v7749_v32 = vadd.f32 %v7708_v48, %v506_v26  ;;  %v6726_v33 = vld [vmem:[%s7581_s9 + $0x374] ss:$20 sps:$4 sm:$0xff]  }
 0x1a1   : > { %7152 = vpow2.f32 %v5623_v41  ;;  %v6152_v51 = vadd.f32 %v1734_v50, %v510_v47  ;;  %v1736_v52 = vpop.f32.mrb[2].mxu1  ;;  %v6735_v40 = vld [vmem:[%s7581_s9 + $0x3a4] ss:$20 sps:$4 sm:$0xff]   ;;  %v6733_v42 = vld [vmem:[%s7581_s9 + $0x3a0] ss:$20 sps:$4 sm:$0xff]  }
 0x1a2   : > { %7154 = vpow2.f32 %v5624_v44  ;;  %4886 = vmatpush1.bf16.msra.mxu0 %v6679_v37  ;;  %v1737_v53 = vpop.f32.mrb[3].mxu1  ;;  %v6727_v37 = vld [vmem:[%s7581_s9 + $0x378] ss:$20 sps:$4 sm:$0xff]   ;;  %v6739_v47 = vld [vmem:[%s7581_s9 + $0x3c8] ss:$20 sps:$4 sm:$0xff]  }
 0x1a3   : > { %4887 = vmatprep.subr.bf16.mxu0 %v6687_v38  ;;  %v5626_v54 = vmul.f32 -1.442695, %v6152_v51  ;;  %v6732_v38 = vld [vmem:[%s7581_s9 + $0x39c] ss:$20 sps:$4 sm:$0xff]   ;;  %v6730_v41 = vld [vmem:[%s7581_s9 + $0x398] ss:$20 sps:$4 sm:$0xff]  }
 0x1a4   : > { %v6738_v44 = vld [vmem:[%s7581_s9 + $0x3c4] ss:$20 sps:$4 sm:$0xff]   ;;  %v6744_v48 = vld [vmem:[%s7581_s9 + $0x3ec] ss:$20 sps:$4 sm:$0xff]   ;;  %v6747_v50 = vld [vmem:[%s7581_s9 + $0x3f4] ss:$20 sps:$4 sm:$0xff]  }
 0x1a5   : > { %7156 = vpow2.f32 %v5626_v54  ;;  %v6745_v52 = vld [vmem:[%s7581_s9 + $0x3f0] ss:$20 sps:$4 sm:$0xff]   ;;  %v6750_v53 = vld [vmem:[%s7581_s9 + $0x414] ss:$20 sps:$4 sm:$0xff]  }
 0x1a6   : > { %4888 = vmatpush1.bf16.msra.mxu0 %v6685_v45  ;;  %v6741_v45 = vld [vmem:[%s7581_s9 + $0x3cc] ss:$20 sps:$4 sm:$0xff]   ;;  %v6753_v54 = vld [vmem:[%s7581_s9 + $0x41c] ss:$20 sps:$4 sm:$0xff]  }
 0x1a7   : > { %4898 = vmatprep.subr.bf16.mxu0 %v6693_v46  ;;  %v6736_v46 = vld [vmem:[%s7581_s9 + $0x3c0] ss:$20 sps:$4 sm:$0xff]  }
 0x1ab   : > { %v7153_v55 = vpop.eup %7152 }
 0x1ac   : > { %v7155_v56 = vpop.eup %7154  ;;  %v2015_v57 = vadd.f32 1.0, %v7153_v55  ;;  %v6748_v55 = vld [vmem:[%s7581_s9 + $0x410] ss:$20 sps:$4 sm:$0xff]  }
 0x1ad   : > { %v2016_v58 = vadd.f32 1.0, %v7155_v56  ;;  %v6751_v56 = vld [vmem:[%s7581_s9 + $0x418] ss:$20 sps:$4 sm:$0xff]  }
 0x1ae   : > { %7158 = vrcp.f32 %v2015_v57  ;;  %v6756_v57 = vld [vmem:[%s7581_s9 + $0x43c] ss:$20 sps:$4 sm:$0xff]  }
 0x1af   : > { %7160 = vrcp.f32 %v2016_v58  ;;  %v7157_v59 = vpop.eup %7156 }
 0x1b0   : > { %v2018_v60 = vadd.f32 1.0, %v7157_v59  ;;  %v6759_v59 = vld [vmem:[%s7581_s9 + $0x444] ss:$20 sps:$4 sm:$0xff]  }
 0x1b2   : > { %7162 = vrcp.f32 %v2018_v60  ;;  %v517_v60 = vsub.s32 5, %v7587_v36 }
 0x1b8   : > { %v7159_v61 = vpop.eup %7158 }
 0x1b9   : > { %v7161_v62 = vpop.eup %7160  ;;  %v2045_v7 = vmul.f32 %v7159_v61, %v6149_v34  ;;  %v6729_v34 = vld [vmem:[%s7581_s9 + $0x37c] ss:$20 sps:$4 sm:$0xff]   ;;  %v6754_v61 = vld [vmem:[%s7581_s9 + $0x438] ss:$20 sps:$4 sm:$0xff]  }
 0x1ba   : > { %v2046_v63 = vmul.f32 %v7161_v62, %v6150_v39  ;;  %v5625_v39 = vmul.f32 -1.442695, %v7749_v32 }
 0x1bb   : > { %v7714_v1 = vpack.c.bf16 %v2045_v7, %v2045_v7  ;;  %v6757_v7 = vld [vmem:[%s7581_s9 + $0x440] ss:$20 sps:$4 sm:$0xff]  }
 0x1bc   : > { %v7712_v0 = vpack.c.bf16 %v2046_v63, %v2046_v63  ;;  %v7163_v9 = vpop.eup %7162  ;;  %7164 = vpow2.f32 %v5625_v39  ;;  %v6762_v63 = vld [vmem:[%s7581_s9 + $0x464] ss:$20 sps:$4 sm:$0xff]  }
 0x1bd   : > { %v2048_v10 = vmul.f32 %v7163_v9, %v6152_v51  ;;  %v6742_v51 = vld [vmem:[%s7581_s9 + $0x3e8] ss:$20 sps:$4 sm:$0xff]  }
 0x1be   : > { %4684 = vmatprep.mubr.bf16.mxu1 %v7712_v0  ;;  %4889 = vmatprep.mubr.bf16.mxu0 %v7712_v0 }
 0x1bf   : > { %4685 = vmatmul.mubr.bf16.vlgmr.msra.gmra.mrb[8].mxu1 %v7714_v1  ;;  %4890 = vmatmul.mubr.bf16.vlgmr.msra.gmra.mrb[12].mxu0 %v7714_v1  ;;  %v7729_v13 = vpack.c.bf16 %v2048_v10, %v2048_v10 }
 0x1c0   : > { %4694 = vmatpush1.bf16.msra.mxu1 %v6688_v14  ;;  %4899 = vmatpush1.bf16.msra.mxu0 %v6691_v49  ;;  %v6765_v14 = vld [vmem:[%s7581_s9 + $0x46c] ss:$20 sps:$4 sm:$0xff]   ;;  %v518_v49 = vrot.slane %v7684_v23, %v517_v60 }
 0x1c1   : > { %4695 = vmatprep.subr.bf16.mxu1 %v6696_v2  ;;  %4900 = vmatprep.subr.bf16.mxu0 %v6699_v3  ;;  %v6760_v2 = vld [vmem:[%s7581_s9 + $0x460] ss:$20 sps:$4 sm:$0xff]   ;;  %v6763_v3 = vld [vmem:[%s7581_s9 + $0x468] ss:$20 sps:$4 sm:$0xff]  }
 0x1c2   : > { %4725 = vmatprep.mubr.bf16.mxu1 %v7729_v13  ;;  %4930 = vmatprep.mubr.bf16.mxu0 %v7729_v13 }
 0x1c4   : > { %4696 = vmatpush1.bf16.msra.mxu1 %v6694_v5  ;;  %4901 = vmatpush1.bf16.msra.mxu0 %v6697_v25  ;;  %v6768_v25 = vld [vmem:[%s7581_s9 + $0x48c] ss:$20 sps:$4 sm:$0xff]  }
 0x1c5   : > { %4697 = vmatprep.subr.bf16.mxu1 %v6702_v6  ;;  %4902 = vmatprep.subr.bf16.mxu0 %v6705_v8  ;;  %v6771_v6 = vld [vmem:[%s7581_s9 + $0x494] ss:$20 sps:$4 sm:$0xff]  }
 0x1c6   : > { %v7165_v58 = vpop.eup %7164 }
 0x1c7   : > { %v2017_v62 = vadd.f32 1.0, %v7165_v58  ;;  %v6810_v58 = vld [vmem:[%s7581_s9 + $0x5a4] ss:$20 sps:$4 sm:$0xff]  }
 0x1c8   : > { %4698 = vmatpush1.bf16.msra.mxu1 %v6700_v11  ;;  %4903 = vmatpush1.bf16.msra.mxu0 %v6703_v12  ;;  %v6766_v12 = vld [vmem:[%s7581_s9 + $0x488] ss:$20 sps:$4 sm:$0xff]  }
 0x1c9   : > { %4699 = vmatprep.subr.bf16.mxu1 %v6708_v15  ;;  %4904 = vmatprep.subr.bf16.mxu0 %v6711_v16  ;;  %7166 = vrcp.f32 %v2017_v62  ;;  %v6769_v15 = vld [vmem:[%s7581_s9 + $0x490] ss:$20 sps:$4 sm:$0xff]  }
 0x1cc   : > { %4700 = vmatpush1.bf16.msra.mxu1 %v6706_v17  ;;  %4905 = vmatpush1.bf16.msra.mxu0 %v6709_v18  ;;  %v6774_v17 = vld [vmem:[%s7581_s9 + $0x4b4] ss:$20 sps:$4 sm:$0xff]   ;;  %v6777_v18 = vld [vmem:[%s7581_s9 + $0x4bc] ss:$20 sps:$4 sm:$0xff]  }
 0x1cd   : > { %4701 = vmatprep.subr.bf16.mxu1 %v6714_v19  ;;  %4906 = vmatprep.subr.bf16.mxu0 %v6717_v20  ;;  %v6772_v19 = vld [vmem:[%s7581_s9 + $0x4b0] ss:$20 sps:$4 sm:$0xff]   ;;  %v6775_v20 = vld [vmem:[%s7581_s9 + $0x4b8] ss:$20 sps:$4 sm:$0xff]  }
 0x1d0   : > { %4702 = vmatpush1.bf16.msra.mxu1 %v6712_v21  ;;  %4907 = vmatpush1.bf16.msra.mxu0 %v6715_v22  ;;  %v6780_v21 = vld [vmem:[%s7581_s9 + $0x4dc] ss:$20 sps:$4 sm:$0xff]   ;;  %v6783_v22 = vld [vmem:[%s7581_s9 + $0x4e4] ss:$20 sps:$4 sm:$0xff]  }
 0x1d1   : > { %4703 = vmatprep.subr.bf16.mxu1 %v6720_v27  ;;  %4908 = vmatprep.subr.bf16.mxu0 %v6723_v29 }
 0x1d3   : > { %v7167_v27 = vpop.eup %7166 }
 0x1d4   : > { %4704 = vmatpush1.bf16.msra.mxu1 %v6718_v30  ;;  %4909 = vmatpush1.bf16.msra.mxu0 %v6721_v31  ;;  %v6778_v31 = vld [vmem:[%s7581_s9 + $0x4d8] ss:$20 sps:$4 sm:$0xff]  }
 0x1d5   : > { %4705 = vmatprep.subr.bf16.mxu1 %v6726_v33  ;;  %4910 = vmatprep.subr.bf16.mxu0 %v6729_v34  ;;  %v6781_v33 = vld [vmem:[%s7581_s9 + $0x4e0] ss:$20 sps:$4 sm:$0xff]  }
 0x1d8   : > { %4706 = vmatpush1.bf16.msra.mxu1 %v6724_v35  ;;  %4911 = vmatpush1.bf16.msra.mxu0 %v6727_v37  ;;  %v2047_v35 = vmul.f32 %v7167_v27, %v7749_v32  ;;  %v6786_v37 = vld [vmem:[%s7581_s9 + $0x504] ss:$20 sps:$4 sm:$0xff]   ;;  %v6792_v32 = vld [vmem:[%s7581_s9 + $0x52c] ss:$20 sps:$4 sm:$0xff]  }
 0x1d9   : > { %4707 = vmatprep.subr.bf16.mxu1 %v6732_v38  ;;  %4912 = vmatprep.subr.bf16.mxu0 %v6735_v40  ;;  %v6789_v38 = vld [vmem:[%s7581_s9 + $0x50c] ss:$20 sps:$4 sm:$0xff]  }
 0x1da   : > { %v6784_v40 = vld [vmem:[%s7581_s9 + $0x500] ss:$20 sps:$4 sm:$0xff]  }
 0x1db   : > { %v6832_v27 = vld [vmem:[%s7581_s9 + $0x640] ss:$20 sps:$4 sm:$0xff]  }
 0x1dc   : > { %4708 = vmatpush1.bf16.msra.mxu1 %v6730_v41  ;;  %4913 = vmatpush1.bf16.msra.mxu0 %v6733_v42  ;;  %v6787_v41 = vld [vmem:[%s7581_s9 + $0x508] ss:$20 sps:$4 sm:$0xff]   ;;  %v7808_v42 = vpack.c.bf16 %v2047_v35, %v2047_v35 }
 0x1dd   : > { %4709 = vmatprep.subr.bf16.mxu1 %v6738_v44  ;;  %4914 = vmatprep.subr.bf16.mxu0 %v6741_v45  ;;  %v6795_v45 = vld [vmem:[%s7581_s9 + $0x534] ss:$20 sps:$4 sm:$0xff]  }
 0x1de   : > { %v6846_v35 = vld [vmem:[%s7581_s9 + $0x694] ss:$20 sps:$4 sm:$0xff]  }
 0x1e0   : > { %4710 = vmatpush1.bf16.msra.mxu1 %v6736_v46  ;;  %4915 = vmatpush1.bf16.msra.mxu0 %v6739_v47  ;;  %v6790_v46 = vld [vmem:[%s7581_s9 + $0x528] ss:$20 sps:$4 sm:$0xff]   ;;  %v6793_v47 = vld [vmem:[%s7581_s9 + $0x530] ss:$20 sps:$4 sm:$0xff]  }
 0x1e1   : > { %4711 = vmatprep.subr.bf16.mxu1 %v6744_v48  ;;  %4916 = vmatprep.subr.bf16.mxu0 %v6747_v50  ;;  %v6798_v48 = vld [vmem:[%s7581_s9 + $0x554] ss:$20 sps:$4 sm:$0xff]   ;;  %v6801_v50 = vld [vmem:[%s7581_s9 + $0x55c] ss:$20 sps:$4 sm:$0xff]  }
 0x1e4   : > { %4712 = vmatpush1.bf16.msra.mxu1 %v6742_v51  ;;  %4917 = vmatpush1.bf16.msra.mxu0 %v6745_v52  ;;  %v6796_v51 = vld [vmem:[%s7581_s9 + $0x550] ss:$20 sps:$4 sm:$0xff]   ;;  %v6799_v52 = vld [vmem:[%s7581_s9 + $0x558] ss:$20 sps:$4 sm:$0xff]  }
 0x1e5   : > { %4713 = vmatprep.subr.bf16.mxu1 %v6750_v53  ;;  %4918 = vmatprep.subr.bf16.mxu0 %v6753_v54  ;;  %v6804_v53 = vld [vmem:[%s7581_s9 + $0x57c] ss:$20 sps:$4 sm:$0xff]   ;;  %v6807_v54 = vld [vmem:[%s7581_s9 + $0x584] ss:$20 sps:$4 sm:$0xff]  }
 0x1e8   : > { %4714 = vmatpush1.bf16.msra.mxu1 %v6748_v55  ;;  %4919 = vmatpush1.bf16.msra.mxu0 %v6751_v56  ;;  %v6802_v55 = vld [vmem:[%s7581_s9 + $0x578] ss:$20 sps:$4 sm:$0xff]   ;;  %v6805_v56 = vld [vmem:[%s7581_s9 + $0x580] ss:$20 sps:$4 sm:$0xff]  }
 0x1e9   : > { %4715 = vmatprep.subr.bf16.mxu1 %v6756_v57  ;;  %4920 = vmatprep.subr.bf16.mxu0 %v6759_v59  ;;  %v6813_v59 = vld [vmem:[%s7581_s9 + $0x5ac] ss:$20 sps:$4 sm:$0xff]  }
 0x1ec   : > { %4716 = vmatpush1.bf16.msra.mxu1 %v6754_v61  ;;  %4921 = vmatpush1.bf16.msra.mxu0 %v6757_v7  ;;  %v7782_v5 = vpop.f32.mrb[4].mxu0  ;;  %v513_v61 = vsub.s32 4, %v7587_v36  ;;  %v6808_v7 = vld [vmem:[%s7581_s9 + $0x5a0] ss:$20 sps:$4 sm:$0xff]  }
 0x1ed   : > { %4717 = vmatprep.subr.bf16.mxu1 %v6762_v63  ;;  %4922 = vmatprep.subr.bf16.mxu0 %v6765_v14  ;;  %v1816_v8 = vpop.f32.mrb[5].mxu0  ;;  %v6811_v63 = vld [vmem:[%s7581_s9 + $0x5a8] ss:$20 sps:$4 sm:$0xff]   ;;  %v525_v14 = vsub.s32 7, %v7587_v36 }
 0x1ee   : > { %v7786_v9 = vadd.f32 %v1816_v8, %v518_v49  ;;  %v1818_v10 = vpop.f32.mrb[6].mxu0  ;;  %v6816_v49 = vld [vmem:[%s7581_s9 + $0x5cc] ss:$20 sps:$4 sm:$0xff]  }
 0x1ef   : > { %v1819_v11 = vpop.f32.mrb[7].mxu0  ;;  %v7797_v26 = vpop.f32.mrb[4].mxu1  ;;  %v526_v8 = vrot.slane %v7684_v23, %v525_v14  ;;  %v6825_v10 = vld [vmem:[%s7581_s9 + $0x5fc] ss:$20 sps:$4 sm:$0xff]   ;;  %v6879_v14 = vld [vmem:[%s7581_s9 + $0x764] ss:$20 sps:$4 sm:$0xff]  }
 0x1f0   : > { %4718 = vmatpush1.bf16.msra.mxu1 %v6760_v2  ;;  %4923 = vmatpush1.bf16.msra.mxu0 %v6763_v3  ;;  %v5628_v16 = vmul.f32 -1.442695, %v7786_v9  ;;  %v7799_v29 = vpop.f32.mrb[5].mxu1  ;;  %v6819_v2 = vld [vmem:[%s7581_s9 + $0x5d4] ss:$20 sps:$4 sm:$0xff]   ;;  %v514_v3 = vrot.slane %v7684_v23, %v513_v61 }
 0x1f1   : > { %4719 = vmatprep.subr.bf16.mxu1 %v6768_v25  ;;  %4924 = vmatprep.subr.bf16.mxu0 %v6771_v6  ;;  %v1900_v30 = vpop.f32.mrb[6].mxu1  ;;  %v6814_v25 = vld [vmem:[%s7581_s9 + $0x5c8] ss:$20 sps:$4 sm:$0xff]   ;;  %v6817_v6 = vld [vmem:[%s7581_s9 + $0x5d0] ss:$20 sps:$4 sm:$0xff]  }
 0x1f2   : > { %7168 = vpow2.f32 %v5628_v16  ;;  %v1901_v34 = vpop.f32.mrb[7].mxu1  ;;  %v7846_v11 = vadd.f32 %v7782_v5, %v514_v3  ;;  %v7851_v16 = vadd.f32 %v7799_v29, %v526_v8  ;;  %v6828_v23 = vld [vmem:[%s7581_s9 + $0x61c] ss:$20 sps:$4 sm:$0xff]   ;;  %v6826_v5 = vld [vmem:[%s7581_s9 + $0x618] ss:$20 sps:$4 sm:$0xff]  }
 0x1f3   : > { %v6835_v29 = vld [vmem:[%s7581_s9 + $0x648] ss:$20 sps:$4 sm:$0xff]   ;;  %v6840_v30 = vld [vmem:[%s7581_s9 + $0x66c] ss:$20 sps:$4 sm:$0xff]   ;;  %v6841_v34 = vld [vmem:[%s7581_s9 + $0x670] ss:$20 sps:$4 sm:$0xff]  }
 0x1f4   : > { %4720 = vmatpush1.bf16.msra.mxu1 %v6766_v12  ;;  %4925 = vmatpush1.bf16.msra.mxu0 %v6769_v15  ;;  %v6820_v12 = vld [vmem:[%s7581_s9 + $0x5f0] ss:$20 sps:$4 sm:$0xff]   ;;  %v6823_v15 = vld [vmem:[%s7581_s9 + $0x5f8] ss:$20 sps:$4 sm:$0xff]  }
 0x1f5   : > { %4721 = vmatprep.subr.bf16.mxu1 %v6774_v17  ;;  %4926 = vmatprep.subr.bf16.mxu0 %v6777_v18  ;;  %v6831_v17 = vld [vmem:[%s7581_s9 + $0x624] ss:$20 sps:$4 sm:$0xff]   ;;  %v5627_v18 = vmul.f32 -1.442695, %v7846_v11 }
 0x1f6   : > { %v6874_v3 = vld [vmem:[%s7581_s9 + $0x758] ss:$20 sps:$4 sm:$0xff]  }
 0x1f7   : > { %v6882_v8 = vld [vmem:[%s7581_s9 + $0x784] ss:$20 sps:$4 sm:$0xff]  }
 0x1f8   : > { %4722 = vmatpush1.bf16.msra.mxu1 %v6772_v19  ;;  %4927 = vmatpush1.bf16.msra.mxu0 %v6775_v20  ;;  %v6829_v19 = vld [vmem:[%s7581_s9 + $0x620] ss:$20 sps:$4 sm:$0xff]   ;;  %v5630_v20 = vmul.f32 -1.442695, %v7851_v16 }
 0x1f9   : > { %4723 = vmatprep.subr.bf16.mxu1 %v6780_v21  ;;  %4928 = vmatprep.subr.bf16.mxu0 %v6783_v22  ;;  %v6834_v21 = vld [vmem:[%s7581_s9 + $0x644] ss:$20 sps:$4 sm:$0xff]   ;;  %v6837_v22 = vld [vmem:[%s7581_s9 + $0x64c] ss:$20 sps:$4 sm:$0xff]  }
 0x1fc   : > { %v7169_v39 = vpop.eup %7168  ;;  %4724 = vmatpush1.bf16.msra.mxu1 %v6778_v31  ;;  %4929 = vmatpush1.bf16.msra.mxu0 %v6781_v33  ;;  %v6843_v31 = vld [vmem:[%s7581_s9 + $0x674] ss:$20 sps:$4 sm:$0xff]  }
 0x1fd   : > { %v2020_v44 = vadd.f32 1.0, %v7169_v39  ;;  %4734 = vmatprep.subr.bf16.mxu1 %v6786_v37  ;;  %4939 = vmatprep.subr.bf16.mxu0 %v6789_v38  ;;  %v6838_v33 = vld [vmem:[%s7581_s9 + $0x668] ss:$20 sps:$4 sm:$0xff]   ;;  %v6844_v38 = vld [vmem:[%s7581_s9 + $0x690] ss:$20 sps:$4 sm:$0xff]  }
 0x1fe   : > { %v6849_v37 = vld [vmem:[%s7581_s9 + $0x69c] ss:$20 sps:$4 sm:$0xff]   ;;  %v6847_v39 = vld [vmem:[%s7581_s9 + $0x698] ss:$20 sps:$4 sm:$0xff]  }
 0x1ff   : > { %7170 = vrcp.f32 %v2020_v44  ;;  %4726 = vmatmul.mubr.bf16.vlgmr.msra.gmra.mrb[8].mxu1 %v7808_v42  ;;  %4931 = vmatmul.mubr.bf16.vlgmr.msra.gmra.mrb[12].mxu0 %v7808_v42  ;;  %v6855_v44 = vld [vmem:[%s7581_s9 + $0x6c4] ss:$20 sps:$4 sm:$0xff]  }
 0x200   : > { %4735 = vmatpush1.bf16.msra.mxu1 %v6784_v40  ;;  %4940 = vmatpush1.bf16.msra.mxu0 %v6787_v41  ;;  %7172 = vpow2.f32 %v5627_v18  ;;  %v6852_v41 = vld [vmem:[%s7581_s9 + $0x6bc] ss:$20 sps:$4 sm:$0xff]   ;;  %v6891_v18 = vld [vmem:[%s7581_s9 + $0x7b4] ss:$20 sps:$4 sm:$0xff]  }
 0x201   : > { %4736 = vmatprep.subr.bf16.mxu1 %v6792_v32  ;;  %4941 = vmatprep.subr.bf16.mxu0 %v6795_v45  ;;  %7174 = vpow2.f32 %v5630_v20 }
 0x204   : > { %4737 = vmatpush1.bf16.msra.mxu1 %v6790_v46  ;;  %4942 = vmatpush1.bf16.msra.mxu0 %v6793_v47  ;;  %v6850_v46 = vld [vmem:[%s7581_s9 + $0x6b8] ss:$20 sps:$4 sm:$0xff]   ;;  %v6853_v47 = vld [vmem:[%s7581_s9 + $0x6c0] ss:$20 sps:$4 sm:$0xff]  }
 0x205   : > { %4738 = vmatprep.subr.bf16.mxu1 %v6798_v48  ;;  %4943 = vmatprep.subr.bf16.mxu0 %v6801_v50  ;;  %v6858_v50 = vld [vmem:[%s7581_s9 + $0x6e4] ss:$20 sps:$4 sm:$0xff]  }
 0x208   : > { %4739 = vmatpush1.bf16.msra.mxu1 %v6796_v51  ;;  %4944 = vmatpush1.bf16.msra.mxu0 %v6799_v52  ;;  %v6861_v51 = vld [vmem:[%s7581_s9 + $0x6ec] ss:$20 sps:$4 sm:$0xff]  }
 0x209   : > { %v7171_v57 = vpop.eup %7170  ;;  %4740 = vmatprep.subr.bf16.mxu1 %v6804_v53  ;;  %4945 = vmatprep.subr.bf16.mxu0 %v6807_v54  ;;  %v6856_v52 = vld [vmem:[%s7581_s9 + $0x6e0] ss:$20 sps:$4 sm:$0xff]   ;;  %v6859_v53 = vld [vmem:[%s7581_s9 + $0x6e8] ss:$20 sps:$4 sm:$0xff]  }
 0x20a   : > { %v2050_v60 = vmul.f32 %v7171_v57, %v7786_v9  ;;  %v6822_v9 = vld [vmem:[%s7581_s9 + $0x5f4] ss:$20 sps:$4 sm:$0xff]   ;;  %v7173_v40 = vpop.eup %7172  ;;  %v6864_v54 = vld [vmem:[%s7581_s9 + $0x70c] ss:$20 sps:$4 sm:$0xff]   ;;  %v6865_v57 = vld [vmem:[%s7581_s9 + $0x710] ss:$20 sps:$4 sm:$0xff]  }
 0x20b   : > { %v7175_v32 = vpop.eup %7174  ;;  %v2019_v45 = vadd.f32 1.0, %v7173_v40  ;;  %v521_v40 = vsub.s32 6, %v7587_v36 }
 0x20c   : > { %v7828_v62 = vpack.c.bf16 %v2050_v60, %v2050_v60  ;;  %4741 = vmatpush1.bf16.msra.mxu1 %v6802_v55  ;;  %4946 = vmatpush1.bf16.msra.mxu0 %v6805_v56  ;;  %v2022_v48 = vadd.f32 1.0, %v7175_v32  ;;  %v6867_v55 = vld [vmem:[%s7581_s9 + $0x714] ss:$20 sps:$4 sm:$0xff]   ;;  %v6868_v60 = vld [vmem:[%s7581_s9 + $0x730] ss:$20 sps:$4 sm:$0xff]  }
 0x20d   : > { %4742 = vmatprep.subr.bf16.mxu1 %v6810_v58  ;;  %4947 = vmatprep.subr.bf16.mxu0 %v6813_v59  ;;  %7176 = vrcp.f32 %v2019_v45  ;;  %v6862_v56 = vld [vmem:[%s7581_s9 + $0x708] ss:$20 sps:$4 sm:$0xff]   ;;  %v6912_v32 = vld [vmem:[%s7581_s9 + $0x84c] ss:$20 sps:$4 sm:$0xff]  }
 0x20e   : > { %4766 = vmatprep.mubr.bf16.mxu1 %v7828_v62  ;;  %4971 = vmatprep.mubr.bf16.mxu0 %v7828_v62  ;;  %7178 = vrcp.f32 %v2022_v48  ;;  %v6870_v58 = vld [vmem:[%s7581_s9 + $0x734] ss:$20 sps:$4 sm:$0xff]   ;;  %v6873_v59 = vld [vmem:[%s7581_s9 + $0x73c] ss:$20 sps:$4 sm:$0xff]  }
 0x20f   : > { %v6915_v45 = vld [vmem:[%s7581_s9 + $0x854] ss:$20 sps:$4 sm:$0xff]  }
 0x210   : > { %4743 = vmatpush1.bf16.msra.mxu1 %v6808_v7  ;;  %4948 = vmatpush1.bf16.msra.mxu0 %v6811_v63  ;;  %v6871_v7 = vld [vmem:[%s7581_s9 + $0x738] ss:$20 sps:$4 sm:$0xff]   ;;  %v6876_v63 = vld [vmem:[%s7581_s9 + $0x75c] ss:$20 sps:$4 sm:$0xff]  }
 0x211   : > { %4744 = vmatprep.subr.bf16.mxu1 %v6816_v49  ;;  %4949 = vmatprep.subr.bf16.mxu0 %v6819_v2 }
 0x214   : > { %4745 = vmatpush1.bf16.msra.mxu1 %v6814_v25  ;;  %4950 = vmatpush1.bf16.msra.mxu0 %v6817_v6  ;;  %v6877_v25 = vld [vmem:[%s7581_s9 + $0x760] ss:$20 sps:$4 sm:$0xff]  }
 0x215   : > { %4746 = vmatprep.subr.bf16.mxu1 %v6822_v9  ;;  %4951 = vmatprep.subr.bf16.mxu0 %v6825_v10  ;;  %v6885_v9 = vld [vmem:[%s7581_s9 + $0x78c] ss:$20 sps:$4 sm:$0xff]  }
 0x217   : > { %v7177_v49 = vpop.eup %7176 }
 0x218   : > { %4747 = vmatpush1.bf16.msra.mxu1 %v6820_v12  ;;  %4952 = vmatpush1.bf16.msra.mxu0 %v6823_v15  ;;  %v7179_v2 = vpop.eup %7178  ;;  %v2049_v6 = vmul.f32 %v7177_v49, %v7846_v11  ;;  %v6880_v12 = vld [vmem:[%s7581_s9 + $0x780] ss:$20 sps:$4 sm:$0xff]   ;;  %v6883_v15 = vld [vmem:[%s7581_s9 + $0x788] ss:$20 sps:$4 sm:$0xff]   ;;  %v6930_v49 = vld [vmem:[%s7581_s9 + $0x8c4] ss:$20 sps:$4 sm:$0xff]  }
 0x219   : > { %4748 = vmatprep.subr.bf16.mxu1 %v6828_v23  ;;  %4953 = vmatprep.subr.bf16.mxu0 %v6831_v17  ;;  %v2052_v10 = vmul.f32 %v7179_v2, %v7851_v16  ;;  %v6888_v11 = vld [vmem:[%s7581_s9 + $0x7ac] ss:$20 sps:$4 sm:$0xff]  }
 0x21a   : > { %v7899_v17 = vpack.c.bf16 %v2049_v6, %v2049_v6  ;;  %v6933_v2 = vld [vmem:[%s7581_s9 + $0x8cc] ss:$20 sps:$4 sm:$0xff]  }
 0x21b   : > { %v6936_v6 = vld [vmem:[%s7581_s9 + $0x8ec] ss:$20 sps:$4 sm:$0xff]  }
 0x21c   : > { %4749 = vmatpush1.bf16.msra.mxu1 %v6826_v5  ;;  %4954 = vmatpush1.bf16.msra.mxu0 %v6829_v19  ;;  %v7903_v19 = vpack.c.bf16 %v2052_v10, %v2052_v10  ;;  %v6937_v10 = vld [vmem:[%s7581_s9 + $0x8f0] ss:$20 sps:$4 sm:$0xff]  }
 0x21d   : > { %4750 = vmatprep.subr.bf16.mxu1 %v6834_v21  ;;  %4955 = vmatprep.subr.bf16.mxu0 %v6837_v22  ;;  %v6886_v21 = vld [vmem:[%s7581_s9 + $0x7a8] ss:$20 sps:$4 sm:$0xff]   ;;  %v6889_v22 = vld [vmem:[%s7581_s9 + $0x7b0] ss:$20 sps:$4 sm:$0xff]  }
 0x220   : > { %4751 = vmatpush1.bf16.msra.mxu1 %v6832_v27  ;;  %4956 = vmatpush1.bf16.msra.mxu0 %v6835_v29  ;;  %v6894_v27 = vld [vmem:[%s7581_s9 + $0x7d4] ss:$20 sps:$4 sm:$0xff]   ;;  %v6897_v29 = vld [vmem:[%s7581_s9 + $0x7dc] ss:$20 sps:$4 sm:$0xff]  }
 0x221   : > { %4752 = vmatprep.subr.bf16.mxu1 %v6840_v30  ;;  %4957 = vmatprep.subr.bf16.mxu0 %v6843_v31  ;;  %v6892_v30 = vld [vmem:[%s7581_s9 + $0x7d0] ss:$20 sps:$4 sm:$0xff]   ;;  %v6895_v31 = vld [vmem:[%s7581_s9 + $0x7d8] ss:$20 sps:$4 sm:$0xff]  }
 0x224   : > { %4753 = vmatpush1.bf16.msra.mxu1 %v6838_v33  ;;  %4958 = vmatpush1.bf16.msra.mxu0 %v6841_v34  ;;  %v6900_v33 = vld [vmem:[%s7581_s9 + $0x7fc] ss:$20 sps:$4 sm:$0xff]   ;;  %v6903_v34 = vld [vmem:[%s7581_s9 + $0x804] ss:$20 sps:$4 sm:$0xff]  }
 0x225   : > { %4754 = vmatprep.subr.bf16.mxu1 %v6846_v35  ;;  %4959 = vmatprep.subr.bf16.mxu0 %v6849_v37  ;;  %v6898_v35 = vld [vmem:[%s7581_s9 + $0x7f8] ss:$20 sps:$4 sm:$0xff]   ;;  %v6901_v37 = vld [vmem:[%s7581_s9 + $0x800] ss:$20 sps:$4 sm:$0xff]  }
 0x228   : > { %4755 = vmatpush1.bf16.msra.mxu1 %v6844_v38  ;;  %4960 = vmatpush1.bf16.msra.mxu0 %v6847_v39  ;;  %v6906_v38 = vld [vmem:[%s7581_s9 + $0x824] ss:$20 sps:$4 sm:$0xff]   ;;  %v6909_v39 = vld [vmem:[%s7581_s9 + $0x82c] ss:$20 sps:$4 sm:$0xff]  }
 0x229   : > { %4756 = vmatprep.subr.bf16.mxu1 %v6852_v41  ;;  %4961 = vmatprep.subr.bf16.mxu0 %v6855_v44  ;;  %v6904_v41 = vld [vmem:[%s7581_s9 + $0x820] ss:$20 sps:$4 sm:$0xff]   ;;  %v6907_v44 = vld [vmem:[%s7581_s9 + $0x828] ss:$20 sps:$4 sm:$0xff]  }
 0x22c   : > { %4757 = vmatpush1.bf16.msra.mxu1 %v6850_v46  ;;  %4962 = vmatpush1.bf16.msra.mxu0 %v6853_v47  ;;  %v7929_v46 = vld [vmem:[%s8229_s2 + $0x8] sm:$0x3]  ;;  %v7192_v47 = vld [vmem:[%s8229_s2] sm:$0xff] }
 0x22d   : > { %4758 = vmatprep.subr.bf16.mxu1 %v6858_v50  ;;  %4963 = vmatprep.subr.bf16.mxu0 %v6861_v51  ;;  %v522_v48 = vrot.slane %v7192_v47, %v521_v40  ;;  %v6910_v50 = vld [vmem:[%s7581_s9 + $0x848] ss:$20 sps:$4 sm:$0xff]   ;;  %v6913_v51 = vld [vmem:[%s7581_s9 + $0x850] ss:$20 sps:$4 sm:$0xff]  }
 0x22e   : > { %v6961_v40 = vld [vmem:[%s7581_s9 + $0x990] ss:$20 sps:$4 sm:$0xff]  }
 0x22f   : > { %v6972_v47 = vld [vmem:[%s7581_s9 + $0x9dc] ss:$20 sps:$4 sm:$0xff]  }
 0x230   : > { %4759 = vmatpush1.bf16.msra.mxu1 %v6856_v52  ;;  %4964 = vmatpush1.bf16.msra.mxu0 %v6859_v53  ;;  %v534_v52 = vrot.slane %v7929_v46, %v7692_v28  ;;  %v6918_v53 = vld [vmem:[%s7581_s9 + $0x874] ss:$20 sps:$4 sm:$0xff]  }
 0x231   : > { %4760 = vmatprep.subr.bf16.mxu1 %v6864_v54  ;;  %4965 = vmatprep.subr.bf16.mxu0 %v6867_v55  ;;  %v6921_v54 = vld [vmem:[%s7581_s9 + $0x87c] ss:$20 sps:$4 sm:$0xff]   ;;  %v7941_v55 = vadd.f32 %v7797_v26, %v522_v48  ;;  %v6922_v26 = vld [vmem:[%s7581_s9 + $0x898] ss:$20 sps:$4 sm:$0xff]  }
 0x232   : > { %v6975_v48 = vld [vmem:[%s7581_s9 + $0x9e4] ss:$20 sps:$4 sm:$0xff]  }
 0x234   : > { %4761 = vmatpush1.bf16.msra.mxu1 %v6862_v56  ;;  %4966 = vmatpush1.bf16.msra.mxu0 %v6865_v57  ;;  %v6916_v56 = vld [vmem:[%s7581_s9 + $0x870] ss:$20 sps:$4 sm:$0xff]   ;;  %v6919_v57 = vld [vmem:[%s7581_s9 + $0x878] ss:$20 sps:$4 sm:$0xff]  }
 0x235   : > { %4762 = vmatprep.subr.bf16.mxu1 %v6870_v58  ;;  %4967 = vmatprep.subr.bf16.mxu0 %v6873_v59  ;;  %v6924_v59 = vld [vmem:[%s7581_s9 + $0x89c] ss:$20 sps:$4 sm:$0xff]  }
 0x238   : > { %4763 = vmatpush1.bf16.msra.mxu1 %v6868_v60  ;;  %4968 = vmatpush1.bf16.msra.mxu0 %v6871_v7  ;;  %v6927_v60 = vld [vmem:[%s7581_s9 + $0x8a4] ss:$20 sps:$4 sm:$0xff]   ;;  %v5629_v7 = vmul.f32 -1.442695, %v7941_v55 }
 0x239   : > { %4764 = vmatprep.subr.bf16.mxu1 %v6876_v63  ;;  %4969 = vmatprep.subr.bf16.mxu0 %v6879_v14  ;;  %v6925_v63 = vld [vmem:[%s7581_s9 + $0x8a0] ss:$20 sps:$4 sm:$0xff]  }
 0x23a   : > { %7180 = vpow2.f32 %v5629_v7  ;;  %v6979_v7 = vld [vmem:[%s7581_s9 + $0xa08] ss:$20 sps:$4 sm:$0xff]  }
 0x23c   : > { %4765 = vmatpush1.bf16.msra.mxu1 %v6874_v3  ;;  %4970 = vmatpush1.bf16.msra.mxu0 %v6877_v25  ;;  %v7897_v23 = vpop.f32.mrb[8].mxu0  ;;  %v6928_v3 = vld [vmem:[%s7581_s9 + $0x8c0] ss:$20 sps:$4 sm:$0xff]   ;;  %v6931_v25 = vld [vmem:[%s7581_s9 + $0x8c8] ss:$20 sps:$4 sm:$0xff]  }
 0x23d   : > { %4775 = vmatprep.subr.bf16.mxu1 %v6882_v8  ;;  %4980 = vmatprep.subr.bf16.mxu0 %v6885_v9  ;;  %v1980_v5 = vpop.f32.mrb[9].mxu0  ;;  %v6939_v8 = vld [vmem:[%s7581_s9 + $0x8f4] ss:$20 sps:$4 sm:$0xff]  }
 0x23e   : > { %v1982_v16 = vpop.f32.mrb[10].mxu0  ;;  %v7945_v58 = vadd.f32 %v1980_v5, %v534_v52  ;;  %v6934_v9 = vld [vmem:[%s7581_s9 + $0x8e8] ss:$20 sps:$4 sm:$0xff]   ;;  %v6970_v52 = vld [vmem:[%s7581_s9 + $0x9d8] ss:$20 sps:$4 sm:$0xff]  }
 0x23f   : > { %4767 = vmatmul.mubr.bf16.vlgmr.msra.gmra.mrb[8].mxu1 %v7899_v17  ;;  %4972 = vmatmul.mubr.bf16.vlgmr.msra.gmra.mrb[12].mxu0 %v7899_v17  ;;  %v1983_v20 = vpop.f32.mrb[11].mxu0  ;;  %v6948_v16 = vld [vmem:[%s7581_s9 + $0x93c] ss:$20 sps:$4 sm:$0xff]  }
 0x240   : > { %4776 = vmatpush1.bf16.msra.mxu1 %v6880_v12  ;;  %4981 = vmatpush1.bf16.msra.mxu0 %v6883_v15  ;;  %v5632_v14 = vmul.f32 -1.442695, %v7945_v58  ;;  %v6942_v12 = vld [vmem:[%s7581_s9 + $0x914] ss:$20 sps:$4 sm:$0xff]   ;;  %v6945_v15 = vld [vmem:[%s7581_s9 + $0x91c] ss:$20 sps:$4 sm:$0xff]  }
 0x241   : > { %4777 = vmatprep.subr.bf16.mxu1 %v6888_v11  ;;  %4982 = vmatprep.subr.bf16.mxu0 %v6891_v18  ;;  %v6940_v11 = vld [vmem:[%s7581_s9 + $0x910] ss:$20 sps:$4 sm:$0xff]   ;;  %v6943_v18 = vld [vmem:[%s7581_s9 + $0x918] ss:$20 sps:$4 sm:$0xff]  }
 0x242   : > { %4807 = vmatprep.mubr.bf16.mxu1 %v7903_v19  ;;  %5012 = vmatprep.mubr.bf16.mxu0 %v7903_v19  ;;  %7182 = vpow2.f32 %v5632_v14  ;;  %v6951_v20 = vld [vmem:[%s7581_s9 + $0x944] ss:$20 sps:$4 sm:$0xff]  }
 0x244   : > { %4778 = vmatpush1.bf16.msra.mxu1 %v6886_v21  ;;  %4983 = vmatpush1.bf16.msra.mxu0 %v6889_v22  ;;  %v7181_v5 = vpop.eup %7180 }
 0x245   : > { %4779 = vmatprep.subr.bf16.mxu1 %v6894_v27  ;;  %4984 = vmatprep.subr.bf16.mxu0 %v6897_v29  ;;  %v2021_v22 = vadd.f32 1.0, %v7181_v5  ;;  %v6946_v27 = vld [vmem:[%s7581_s9 + $0x938] ss:$20 sps:$4 sm:$0xff]   ;;  %v6949_v29 = vld [vmem:[%s7581_s9 + $0x940] ss:$20 sps:$4 sm:$0xff]  }
 0x246   : > { %v7003_v5 = vld [vmem:[%s7581_s9 + $0xaa8] ss:$20 sps:$4 sm:$0xff]  }
 0x247   : > { %7184 = vrcp.f32 %v2021_v22  ;;  %v7006_v22 = vld [vmem:[%s7581_s9 + $0xac8] ss:$20 sps:$4 sm:$0xff]  }
 0x248   : > { %4780 = vmatpush1.bf16.msra.mxu1 %v6892_v30  ;;  %4985 = vmatpush1.bf16.msra.mxu0 %v6895_v31  ;;  %v6954_v30 = vld [vmem:[%s7581_s9 + $0x964] ss:$20 sps:$4 sm:$0xff]   ;;  %v6957_v31 = vld [vmem:[%s7581_s9 + $0x96c] ss:$20 sps:$4 sm:$0xff]  }
 0x249   : > { %4781 = vmatprep.subr.bf16.mxu1 %v6900_v33  ;;  %4986 = vmatprep.subr.bf16.mxu0 %v6903_v34  ;;  %v6952_v34 = vld [vmem:[%s7581_s9 + $0x960] ss:$20 sps:$4 sm:$0xff]  }
 0x24c   : > { %4782 = vmatpush1.bf16.msra.mxu1 %v6898_v35  ;;  %4987 = vmatpush1.bf16.msra.mxu0 %v6901_v37  ;;  %v7183_v21 = vpop.eup %7182  ;;  %v6955_v35 = vld [vmem:[%s7581_s9 + $0x968] ss:$20 sps:$4 sm:$0xff]   ;;  %v6960_v37 = vld [vmem:[%s7581_s9 + $0x98c] ss:$20 sps:$4 sm:$0xff]  }
 0x24d   : > { %4783 = vmatprep.subr.bf16.mxu1 %v6906_v38  ;;  %4988 = vmatprep.subr.bf16.mxu0 %v6909_v39  ;;  %v2024_v33 = vadd.f32 1.0, %v7183_v21  ;;  %v6963_v38 = vld [vmem:[%s7581_s9 + $0x994] ss:$20 sps:$4 sm:$0xff]   ;;  %v530_v21 = vrot.slane %v7929_v46, %v7687_v24  ;;  %v7012_v46 = vld [vmem:[%s7581_s9 + $0xaf0] ss:$20 sps:$4 sm:$0xff]  }
 0x24e   : > { %v6958_v39 = vld [vmem:[%s7581_s9 + $0x988] ss:$20 sps:$4 sm:$0xff]  }
 0x24f   : > { %7186 = vrcp.f32 %v2024_v33  ;;  %v7015_v33 = vld [vmem:[%s7581_s9 + $0xaf8] ss:$20 sps:$4 sm:$0xff]  }
 0x250   : > { %4784 = vmatpush1.bf16.msra.mxu1 %v6904_v41  ;;  %4989 = vmatpush1.bf16.msra.mxu0 %v6907_v44  ;;  %v6966_v41 = vld [vmem:[%s7581_s9 + $0x9b4] ss:$20 sps:$4 sm:$0xff]   ;;  %v6969_v44 = vld [vmem:[%s7581_s9 + $0x9bc] ss:$20 sps:$4 sm:$0xff]  }
 0x251   : > { %4785 = vmatprep.subr.bf16.mxu1 %v6912_v32  ;;  %4990 = vmatprep.subr.bf16.mxu0 %v6915_v45  ;;  %v6964_v32 = vld [vmem:[%s7581_s9 + $0x9b0] ss:$20 sps:$4 sm:$0xff]   ;;  %v6967_v45 = vld [vmem:[%s7581_s9 + $0x9b8] ss:$20 sps:$4 sm:$0xff]  }
 0x254   : > { %4786 = vmatpush1.bf16.msra.mxu1 %v6910_v50  ;;  %4991 = vmatpush1.bf16.msra.mxu0 %v6913_v51  ;;  %v7185_v50 = vpop.eup %7184 }
 0x255   : > { %4787 = vmatprep.subr.bf16.mxu1 %v6918_v53  ;;  %4992 = vmatprep.subr.bf16.mxu0 %v6921_v54  ;;  %v6973_v53 = vld [vmem:[%s7581_s9 + $0x9e0] ss:$20 sps:$4 sm:$0xff]   ;;  %v2051_v54 = vmul.f32 %v7185_v50, %v7941_v55 }
 0x256   : > { %v6987_v55 = vld [vmem:[%s7581_s9 + $0xa34] ss:$20 sps:$4 sm:$0xff]  }
 0x257   : > { %v7038_v50 = vld [vmem:[%s7581_s9 + $0xb94] ss:$20 sps:$4 sm:$0xff]  }
 0x258   : > { %4788 = vmatpush1.bf16.msra.mxu1 %v6916_v56  ;;  %4993 = vmatpush1.bf16.msra.mxu0 %v6919_v57  ;;  %v6978_v56 = vld [vmem:[%s7581_s9 + $0xa04] ss:$20 sps:$4 sm:$0xff]   ;;  %v6981_v57 = vld [vmem:[%s7581_s9 + $0xa0c] ss:$20 sps:$4 sm:$0xff]  }
 0x259   : > { %4789 = vmatprep.subr.bf16.mxu1 %v6924_v59  ;;  %4994 = vmatprep.subr.bf16.mxu0 %v6927_v60  ;;  %v7187_v51 = vpop.eup %7186  ;;  %v6976_v60 = vld [vmem:[%s7581_s9 + $0xa00] ss:$20 sps:$4 sm:$0xff]  }
 0x25a   : > { %v2054_v59 = vmul.f32 %v7187_v51, %v7945_v58  ;;  %v6982_v58 = vld [vmem:[%s7581_s9 + $0xa28] ss:$20 sps:$4 sm:$0xff]  }
 0x25b   : > { %v7041_v51 = vld [vmem:[%s7581_s9 + $0xb9c] ss:$20 sps:$4 sm:$0xff]  }
 0x25c   : > { %4790 = vmatpush1.bf16.msra.mxu1 %v6922_v26  ;;  %4995 = vmatpush1.bf16.msra.mxu0 %v6925_v63  ;;  %v7991_v26 = vpack.c.bf16 %v2051_v54, %v2051_v54  ;;  %v6984_v63 = vld [vmem:[%s7581_s9 + $0xa2c] ss:$20 sps:$4 sm:$0xff]   ;;  %v7995_v14 = vpack.c.bf16 %v2054_v59, %v2054_v59 }
 0x25d   : > { %4791 = vmatprep.subr.bf16.mxu1 %v6930_v49  ;;  %4996 = vmatprep.subr.bf16.mxu0 %v6933_v2  ;;  %v6985_v49 = vld [vmem:[%s7581_s9 + $0xa30] ss:$20 sps:$4 sm:$0xff]   ;;  %v6990_v2 = vld [vmem:[%s7581_s9 + $0xa54] ss:$20 sps:$4 sm:$0xff]  }
 0x260   : > { %4792 = vmatpush1.bf16.msra.mxu1 %v6928_v3  ;;  %4997 = vmatpush1.bf16.msra.mxu0 %v6931_v25  ;;  %v6993_v3 = vld [vmem:[%s7581_s9 + $0xa5c] ss:$20 sps:$4 sm:$0xff]  }
 0x261   : > { %4793 = vmatprep.subr.bf16.mxu1 %v6936_v6  ;;  %4998 = vmatprep.subr.bf16.mxu0 %v6939_v8  ;;  %v6988_v25 = vld [vmem:[%s7581_s9 + $0xa50] ss:$20 sps:$4 sm:$0xff]   ;;  %v6991_v6 = vld [vmem:[%s7581_s9 + $0xa58] ss:$20 sps:$4 sm:$0xff]  }
 0x262   : > { %v6996_v8 = vld [vmem:[%s7581_s9 + $0xa7c] ss:$20 sps:$4 sm:$0xff]  }
 0x264   : > { %4794 = vmatpush1.bf16.msra.mxu1 %v6934_v9  ;;  %4999 = vmatpush1.bf16.msra.mxu0 %v6937_v10  ;;  %v6999_v9 = vld [vmem:[%s7581_s9 + $0xa84] ss:$20 sps:$4 sm:$0xff]  }
 0x265   : > { %4795 = vmatprep.subr.bf16.mxu1 %v6942_v12  ;;  %5000 = vmatprep.subr.bf16.mxu0 %v6945_v15  ;;  %v6994_v10 = vld [vmem:[%s7581_s9 + $0xa78] ss:$20 sps:$4 sm:$0xff]   ;;  %v6997_v12 = vld [vmem:[%s7581_s9 + $0xa80] ss:$20 sps:$4 sm:$0xff]  }
 0x266   : > { %v7002_v15 = vld [vmem:[%s7581_s9 + $0xaa4] ss:$20 sps:$4 sm:$0xff]  }
 0x268   : > { %4796 = vmatpush1.bf16.msra.mxu1 %v6940_v11  ;;  %5001 = vmatpush1.bf16.msra.mxu0 %v6943_v18  ;;  %v7005_v11 = vld [vmem:[%s7581_s9 + $0xaac] ss:$20 sps:$4 sm:$0xff]  }
 0x269   : > { %4797 = vmatprep.subr.bf16.mxu1 %v6948_v16  ;;  %5002 = vmatprep.subr.bf16.mxu0 %v6951_v20  ;;  %v7000_v18 = vld [vmem:[%s7581_s9 + $0xaa0] ss:$20 sps:$4 sm:$0xff]  }
 0x26a   : > { %v7008_v16 = vld [vmem:[%s7581_s9 + $0xacc] ss:$20 sps:$4 sm:$0xff]   ;;  %v7011_v20 = vld [vmem:[%s7581_s9 + $0xad4] ss:$20 sps:$4 sm:$0xff]  }
 0x26c   : > { %4798 = vmatpush1.bf16.msra.mxu1 %v6946_v27  ;;  %5003 = vmatpush1.bf16.msra.mxu0 %v6949_v29  ;;  %v7009_v27 = vld [vmem:[%s7581_s9 + $0xad0] ss:$20 sps:$4 sm:$0xff]   ;;  %v7014_v29 = vld [vmem:[%s7581_s9 + $0xaf4] ss:$20 sps:$4 sm:$0xff]  }
 0x26d   : > { %4799 = vmatprep.subr.bf16.mxu1 %v6954_v30  ;;  %5004 = vmatprep.subr.bf16.mxu0 %v6957_v31  ;;  %v7017_v30 = vld [vmem:[%s7581_s9 + $0xafc] ss:$20 sps:$4 sm:$0xff]   ;;  %v8024_v31 = vadd.f32 %v7897_v23, %v530_v21  ;;  %v7018_v23 = vld [vmem:[%s7581_s9 + $0xb18] ss:$20 sps:$4 sm:$0xff]  }
 0x26e   : > { %v7072_v21 = vld [vmem:[%s7581_s9 + $0x150] ss:$20 sps:$4 sm:$0xff]  }
 0x270   : > { %4800 = vmatpush1.bf16.msra.mxu1 %v6952_v34  ;;  %5005 = vmatpush1.bf16.msra.mxu0 %v6955_v35  ;;  %v7020_v34 = vld [vmem:[%s7581_s9 + $0xb1c] ss:$20 sps:$4 sm:$0xff]   ;;  %v7023_v35 = vld [vmem:[%s7581_s9 + $0xb24] ss:$20 sps:$4 sm:$0xff]  }
 0x271   : > { %4801 = vmatprep.subr.bf16.mxu1 %v6960_v37  ;;  %5006 = vmatprep.subr.bf16.mxu0 %v6963_v38  ;;  %v5631_v37 = vmul.f32 -1.442695, %v8024_v31  ;;  %v7021_v38 = vld [vmem:[%s7581_s9 + $0xb20] ss:$20 sps:$4 sm:$0xff]  }
 0x273   : > { %7188 = vpow2.f32 %v5631_v37  ;;  %v7081_v37 = vld [vmem:[%s7581_s9 + $0x920] ss:$20 sps:$4 sm:$0xff]  }
 0x274   : > { %4802 = vmatpush1.bf16.msra.mxu1 %v6958_v39  ;;  %5007 = vmatpush1.bf16.msra.mxu0 %v6961_v40  ;;  %v7026_v39 = vld [vmem:[%s7581_s9 + $0xb44] ss:$20 sps:$4 sm:$0xff]   ;;  %v7029_v40 = vld [vmem:[%s7581_s9 + $0xb4c] ss:$20 sps:$4 sm:$0xff]  }
 0x275   : > { %4803 = vmatprep.subr.bf16.mxu1 %v6966_v41  ;;  %5008 = vmatprep.subr.bf16.mxu0 %v6969_v44  ;;  %v7024_v41 = vld [vmem:[%s7581_s9 + $0xb40] ss:$20 sps:$4 sm:$0xff]   ;;  %v7027_v44 = vld [vmem:[%s7581_s9 + $0xb48] ss:$20 sps:$4 sm:$0xff]  }
 0x278   : > { %4804 = vmatpush1.bf16.msra.mxu1 %v6964_v32  ;;  %5009 = vmatpush1.bf16.msra.mxu0 %v6967_v45  ;;  %v7032_v32 = vld [vmem:[%s7581_s9 + $0xb6c] ss:$20 sps:$4 sm:$0xff]   ;;  %v7035_v45 = vld [vmem:[%s7581_s9 + $0xb74] ss:$20 sps:$4 sm:$0xff]  }
 0x279   : > { %4805 = vmatprep.subr.bf16.mxu1 %v6972_v47  ;;  %5010 = vmatprep.subr.bf16.mxu0 %v6975_v48  ;;  %v7030_v47 = vld [vmem:[%s7581_s9 + $0xb68] ss:$20 sps:$4 sm:$0xff]   ;;  %v7033_v48 = vld [vmem:[%s7581_s9 + $0xb70] ss:$20 sps:$4 sm:$0xff]  }
 0x27c   : > { %4806 = vmatpush1.bf16.msra.mxu1 %v6970_v52  ;;  %5011 = vmatpush1.bf16.msra.mxu0 %v6973_v53  ;;  %v7036_v52 = vld [vmem:[%s7581_s9 + $0xb90] ss:$20 sps:$4 sm:$0xff]   ;;  %v7039_v53 = vld [vmem:[%s7581_s9 + $0xb98] ss:$20 sps:$4 sm:$0xff]  }
 0x27d   : > { %4816 = vmatprep.subr.bf16.mxu1 %v6978_v56  ;;  %5021 = vmatprep.subr.bf16.mxu0 %v6981_v57  ;;  %v7189_v54 = vpop.eup %7188  ;;  %v7044_v56 = vld [vmem:[%s7581_s9 + $0xbbc] ss:$20 sps:$4 sm:$0xff]   ;;  %v7047_v57 = vld [vmem:[%s7581_s9 + $0xbc4] ss:$20 sps:$4 sm:$0xff]  }
 0x27e   : > { %v2023_v59 = vadd.f32 1.0, %v7189_v54  ;;  %v7098_v54 = vld [vmem:[%s7581_s9 + $0x100] ss:$20 sps:$4 sm:$0xff]  }
 0x27f   : > { %4808 = vmatmul.mubr.bf16.vlgmr.msra.gmra.mrb[8].mxu1 %v7991_v26  ;;  %5013 = vmatmul.mubr.bf16.vlgmr.msra.gmra.mrb[12].mxu0 %v7991_v26 }
 0x280   : > { %4817 = vmatpush1.bf16.msra.mxu1 %v6976_v60  ;;  %5022 = vmatpush1.bf16.msra.mxu0 %v6979_v7  ;;  %v7042_v60 = vld [vmem:[%s7581_s9 + $0xbb8] ss:$20 sps:$4 sm:$0xff]   ;;  %v7045_v7 = vld [vmem:[%s7581_s9 + $0xbc0] ss:$20 sps:$4 sm:$0xff]   ;;  %7190 = vrcp.f32 %v2023_v59  ;;  %v7101_v59 = vld [vmem:[%s7581_s9 + $0x9e8] ss:$20 sps:$4 sm:$0xff]  }
 0x281   : > { %4818 = vmatprep.subr.bf16.mxu1 %v6984_v63  ;;  %5023 = vmatprep.subr.bf16.mxu0 %v6987_v55  ;;  %v7050_v63 = vld [vmem:[%s7581_s9 + $0xbe4] ss:$20 sps:$4 sm:$0xff]   ;;  %v7053_v55 = vld [vmem:[%s7581_s9 + $0xbec] ss:$20 sps:$4 sm:$0xff]  }
 0x282   : > { %4848 = vmatprep.mubr.bf16.mxu1 %v7995_v14  ;;  %5053 = vmatprep.mubr.bf16.mxu0 %v7995_v14 }
 0x284   : > { %4819 = vmatpush1.bf16.msra.mxu1 %v6982_v58  ;;  %5024 = vmatpush1.bf16.msra.mxu0 %v6985_v49  ;;  %v7048_v58 = vld [vmem:[%s7581_s9 + $0xbe0] ss:$20 sps:$4 sm:$0xff]   ;;  %v7051_v49 = vld [vmem:[%s7581_s9 + $0xbe8] ss:$20 sps:$4 sm:$0xff]  }
 0x285   : > { %4820 = vmatprep.subr.bf16.mxu1 %v6990_v2  ;;  %5025 = vmatprep.subr.bf16.mxu0 %v6993_v3  ;;  %v7056_v2 = vld [vmem:[%s7581_s9 + $0xc0c] ss:$20 sps:$4 sm:$0xff]   ;;  %v7059_v3 = vld [vmem:[%s7581_s9 + $0xc14] ss:$20 sps:$4 sm:$0xff]  }
 0x288   : > { %4821 = vmatpush1.bf16.msra.mxu1 %v6988_v25  ;;  %5026 = vmatpush1.bf16.msra.mxu0 %v6991_v6  ;;  %v7054_v25 = vld [vmem:[%s7581_s9 + $0xc08] ss:$20 sps:$4 sm:$0xff]   ;;  %v7057_v6 = vld [vmem:[%s7581_s9 + $0xc10] ss:$20 sps:$4 sm:$0xff]  }
 0x289   : > { %4822 = vmatprep.subr.bf16.mxu1 %v6996_v8  ;;  %5027 = vmatprep.subr.bf16.mxu0 %v6999_v9  ;;  %v7062_v8 = vld [vmem:[%s7581_s9 + $0xc34] ss:$20 sps:$4 sm:$0xff]   ;;  %v7065_v9 = vld [vmem:[%s7581_s9 + $0xc3c] ss:$20 sps:$4 sm:$0xff]  }
 0x28c   : > { %4823 = vmatpush1.bf16.msra.mxu1 %v6994_v10  ;;  %5028 = vmatpush1.bf16.msra.mxu0 %v6997_v12  ;;  %v7060_v10 = vld [vmem:[%s7581_s9 + $0xc30] ss:$20 sps:$4 sm:$0xff]   ;;  %v7063_v12 = vld [vmem:[%s7581_s9 + $0xc38] ss:$20 sps:$4 sm:$0xff]  }
 0x28d   : > { %4824 = vmatprep.subr.bf16.mxu1 %v7002_v15  ;;  %5029 = vmatprep.subr.bf16.mxu0 %v7005_v11  ;;  %v7068_v15 = vld [vmem:[%s7581_s9 + $0xc5c] ss:$20 sps:$4 sm:$0xff]   ;;  %v7071_v11 = vld [vmem:[%s7581_s9 + $0xc64] ss:$20 sps:$4 sm:$0xff]  }
 0x290   : > { %4825 = vmatpush1.bf16.msra.mxu1 %v7000_v18  ;;  %5030 = vmatpush1.bf16.msra.mxu0 %v7003_v5  ;;  %v7191_v18 = vpop.eup %7190  ;;  %v7066_v5 = vld [vmem:[%s7581_s9 + $0xc58] ss:$20 sps:$4 sm:$0xff]  }
 0x291   : > { %4826 = vmatprep.subr.bf16.mxu1 %v7008_v16  ;;  %5031 = vmatprep.subr.bf16.mxu0 %v7011_v20  ;;  %v7069_v16 = vld [vmem:[%s7581_s9 + $0xc60] ss:$20 sps:$4 sm:$0xff]   ;;  %v2053_v20 = vmul.f32 %v7191_v18, %v8024_v31  ;;  %v7078_v31 = vld [vmem:[%s7581_s9 + $0x38] ss:$20 sps:$4 sm:$0xff]   ;;  %v7121_v18 = vld [vmem:[%s7581_s9 + $0x510] ss:$20 sps:$4 sm:$0xff]  }
 0x294   : > { %4827 = vmatpush1.bf16.msra.mxu1 %v7006_v22  ;;  %5032 = vmatpush1.bf16.msra.mxu0 %v7009_v27  ;;  %v7073_v22 = vld [vmem:[%s7581_s9 + $0x8d0] ss:$20 sps:$4 sm:$0xff]  }
 0x295   : > { %4828 = vmatprep.subr.bf16.mxu1 %v7014_v29  ;;  %5033 = vmatprep.subr.bf16.mxu0 %v7017_v30  ;;  %v7074_v27 = vld [vmem:[%s7581_s9 + $0x10] ss:$20 sps:$4 sm:$0xff]   ;;  %v8069_v29 = vpack.c.bf16 %v2053_v20, %v2053_v20  ;;  %v7124_v20 = vld [vmem:[%s7581_s9 + $0x6a0] ss:$20 sps:$4 sm:$0xff]  }
 0x296   : > { %v7075_v30 = vld [vmem:[%s7581_s9 + $0x790] ss:$20 sps:$4 sm:$0xff]  }
 0x298   : > { %4829 = vmatpush1.bf16.msra.mxu1 %v7012_v46  ;;  %5034 = vmatpush1.bf16.msra.mxu0 %v7015_v33  ;;  %v7076_v46 = vld [vmem:[%s7581_s9 + $0x178] ss:$20 sps:$4 sm:$0xff]  }
 0x299   : > { %4830 = vmatprep.subr.bf16.mxu1 %v7020_v34  ;;  %5035 = vmatprep.subr.bf16.mxu0 %v7023_v35  ;;  %v7077_v33 = vld [vmem:[%s7581_s9 + $0x8f8] ss:$20 sps:$4 sm:$0xff]   ;;  %v7080_v35 = vld [vmem:[%s7581_s9 + $0x1a0] ss:$20 sps:$4 sm:$0xff]  }
 0x29a   : > { %v7079_v34 = vld [vmem:[%s7581_s9 + $0x7b8] ss:$20 sps:$4 sm:$0xff]  }
 0x29c   : > { %4831 = vmatpush1.bf16.msra.mxu1 %v7018_v23  ;;  %5036 = vmatpush1.bf16.msra.mxu0 %v7021_v38  ;;  %v7082_v23 = vld [vmem:[%s7581_s9 + $0x60] ss:$20 sps:$4 sm:$0xff]   ;;  %v7084_v38 = vld [vmem:[%s7581_s9 + $0x1c8] ss:$20 sps:$4 sm:$0xff]  }
 0x29d   : > { %4832 = vmatprep.subr.bf16.mxu1 %v7026_v39  ;;  %5037 = vmatprep.subr.bf16.mxu0 %v7029_v40  ;;  %v7085_v39 = vld [vmem:[%s7581_s9 + $0x948] ss:$20 sps:$4 sm:$0xff]  }
 0x29e   : > { %v7087_v40 = vld [vmem:[%s7581_s9 + $0x808] ss:$20 sps:$4 sm:$0xff]  }
 0x2a0   : > { %4833 = vmatpush1.bf16.msra.mxu1 %v7024_v41  ;;  %5038 = vmatpush1.bf16.msra.mxu0 %v7027_v44  ;;  %v7088_v41 = vld [vmem:[%s7581_s9 + $0x1f0] ss:$20 sps:$4 sm:$0xff]  }
 0x2a1   : > { %4834 = vmatprep.subr.bf16.mxu1 %v7032_v32  ;;  %5039 = vmatprep.subr.bf16.mxu0 %v7035_v45  ;;  %v7089_v44 = vld [vmem:[%s7581_s9 + $0x970] ss:$20 sps:$4 sm:$0xff]  }
 0x2a2   : > { %v7090_v32 = vld [vmem:[%s7581_s9 + $0xb0] ss:$20 sps:$4 sm:$0xff]  }
 0x2a3   : > { %v7091_v45 = vld [vmem:[%s7581_s9 + $0x830] ss:$20 sps:$4 sm:$0xff]  }
 0x2a4   : > { %4835 = vmatpush1.bf16.msra.mxu1 %v7030_v47  ;;  %5040 = vmatpush1.bf16.msra.mxu0 %v7033_v48  ;;  %v7092_v47 = vld [vmem:[%s7581_s9 + $0x218] ss:$20 sps:$4 sm:$0xff]  }
 0x2a5   : > { %4836 = vmatprep.subr.bf16.mxu1 %v7038_v50  ;;  %5041 = vmatprep.subr.bf16.mxu0 %v7041_v51  ;;  %v7093_v48 = vld [vmem:[%s7581_s9 + $0x998] ss:$20 sps:$4 sm:$0xff]  }
 0x2a6   : > { %v7094_v50 = vld [vmem:[%s7581_s9 + $0xd8] ss:$20 sps:$4 sm:$0xff]  }
 0x2a7   : > { %v7095_v51 = vld [vmem:[%s7581_s9 + $0x858] ss:$20 sps:$4 sm:$0xff]  }
 0x2a8   : > { %4837 = vmatpush1.bf16.msra.mxu1 %v7036_v52  ;;  %5042 = vmatpush1.bf16.msra.mxu0 %v7039_v53  ;;  %v7096_v52 = vld [vmem:[%s7581_s9 + $0x240] ss:$20 sps:$4 sm:$0xff]  }
 0x2a9   : > { %4838 = vmatprep.subr.bf16.mxu1 %v7044_v56  ;;  %5043 = vmatprep.subr.bf16.mxu0 %v7047_v57  ;;  %v7097_v53 = vld [vmem:[%s7581_s9 + $0x9c0] ss:$20 sps:$4 sm:$0xff]   ;;  %v7100_v57 = vld [vmem:[%s7581_s9 + $0x268] ss:$20 sps:$4 sm:$0xff]  }
 0x2aa   : > { %v7099_v56 = vld [vmem:[%s7581_s9 + $0x880] ss:$20 sps:$4 sm:$0xff]  }
 0x2ac   : > { %4839 = vmatpush1.bf16.msra.mxu1 %v7042_v60  ;;  %5044 = vmatpush1.bf16.msra.mxu0 %v7045_v7  ;;  %v7102_v60 = vld [vmem:[%s7581_s9 + $0x128] ss:$20 sps:$4 sm:$0xff]  }
 0x2ad   : > { %4840 = vmatprep.subr.bf16.mxu1 %v7050_v63  ;;  %5045 = vmatprep.subr.bf16.mxu0 %v7053_v55  ;;  %v7103_v7 = vld [vmem:[%s7581_s9 + $0x8a8] ss:$20 sps:$4 sm:$0xff]   ;;  %v7104_v63 = vld [vmem:[%s7581_s9 + $0x3d0] ss:$20 sps:$4 sm:$0xff]  }
 0x2ae   : > { %v7105_v55 = vld [vmem:[%s7581_s9 + $0x290] ss:$20 sps:$4 sm:$0xff]  }
 0x2b0   : > { %4841 = vmatpush1.bf16.msra.mxu1 %v7048_v58  ;;  %5046 = vmatpush1.bf16.msra.mxu0 %v7051_v49  ;;  %v7106_v58 = vld [vmem:[%s7581_s9 + $0x3f8] ss:$20 sps:$4 sm:$0xff]  }
 0x2b1   : > { %4842 = vmatprep.subr.bf16.mxu1 %v7056_v2  ;;  %5047 = vmatprep.subr.bf16.mxu0 %v7059_v3  ;;  %v7107_v49 = vld [vmem:[%s7581_s9 + $0x2b8] ss:$20 sps:$4 sm:$0xff]   ;;  %v7108_v2 = vld [vmem:[%s7581_s9 + $0x420] ss:$20 sps:$4 sm:$0xff]  }
 0x2b2   : > { %v7109_v3 = vld [vmem:[%s7581_s9 + $0x2e0] ss:$20 sps:$4 sm:$0xff]  }
 0x2b4   : > { %4843 = vmatpush1.bf16.msra.mxu1 %v7054_v25  ;;  %5048 = vmatpush1.bf16.msra.mxu0 %v7057_v6  ;;  %v7110_v25 = vld [vmem:[%s7581_s9 + $0x448] ss:$20 sps:$4 sm:$0xff]   ;;  %v7113_v6 = vld [vmem:[%s7581_s9 + $0x330] ss:$20 sps:$4 sm:$0xff]  }
 0x2b5   : > { %4844 = vmatprep.subr.bf16.mxu1 %v7062_v8  ;;  %5049 = vmatprep.subr.bf16.mxu0 %v7065_v9  ;;  %v7115_v8 = vld [vmem:[%s7581_s9 + $0x358] ss:$20 sps:$4 sm:$0xff]   ;;  %v7116_v9 = vld [vmem:[%s7581_s9 + $0x4c0] ss:$20 sps:$4 sm:$0xff]  }
 0x2b8   : > { %4845 = vmatpush1.bf16.msra.mxu1 %v7060_v10  ;;  %5050 = vmatpush1.bf16.msra.mxu0 %v7063_v12  ;;  %v7117_v10 = vld [vmem:[%s7581_s9 + $0x380] ss:$20 sps:$4 sm:$0xff]   ;;  %v7118_v12 = vld [vmem:[%s7581_s9 + $0x4e8] ss:$20 sps:$4 sm:$0xff]  }
 0x2b9   : > { %4846 = vmatprep.subr.bf16.mxu1 %v7068_v15  ;;  %5051 = vmatprep.subr.bf16.mxu0 %v7071_v11  ;;  %v7119_v15 = vld [vmem:[%s7581_s9 + $0x3a8] ss:$20 sps:$4 sm:$0xff]   ;;  %v7120_v11 = vld [vmem:[%s7581_s9 + $0x650] ss:$20 sps:$4 sm:$0xff]  }
 0x2bc   : > { %4847 = vmatpush1.bf16.msra.mxu1 %v7066_v5  ;;  %5052 = vmatpush1.bf16.msra.mxu0 %v7069_v16  ;;  %v7122_v5 = vld [vmem:[%s7581_s9 + $0x678] ss:$20 sps:$4 sm:$0xff]  }
 0x2bd   : > { %6039 = vmatprep.subr.bf16.mxu1 %v7072_v21  ;;  %6105 = vmatprep.subr.bf16.mxu0 %v7073_v22  ;;  %v7123_v16 = vld [vmem:[%s7581_s9 + $0x538] ss:$20 sps:$4 sm:$0xff]   ;;  %v7125_v21 = vld [vmem:[%s7581_s9 + $0x560] ss:$20 sps:$4 sm:$0xff]   ;;  %v7126_v22 = vld [vmem:[%s7581_s9 + $0x6c8] ss:$20 sps:$4 sm:$0xff]  }
 0x2bf   : > { %4849 = vmatmul.mubr.bf16.vlgmr.msra.gmra.mrb[8].mxu1 %v8069_v29  ;;  %5054 = vmatmul.mubr.bf16.vlgmr.msra.gmra.mrb[12].mxu0 %v8069_v29 }
 0x2c0   : > { %6040 = vmatpush3.bf16.msra.mxu1 %v7074_v27  ;;  %5094 = vmatprep.mubr.bf16.mxu1 %v7712_v0  ;;  %v7083_v0 = vld [vmem:[%s7581_s9 + $0x7e0] ss:$20 sps:$4 sm:$0xff]   ;;  %v7127_v27 = vld [vmem:[%s7581_s9 + $0x588] ss:$20 sps:$4 sm:$0xff]  }
 0x2c1   : > { %6106 = vmatpush3.bf16.msra.mxu0 %v7075_v30  ;;  %5214 = vmatprep.mubr.bf16.mxu0 %v7903_v19  ;;  %v7086_v19 = vld [vmem:[%s7581_s9 + $0x88] ss:$20 sps:$4 sm:$0xff]   ;;  %v7129_v30 = vld [vmem:[%s7581_s9 + $0x5b0] ss:$20 sps:$4 sm:$0xff]  }
 0x2c2   : > { %6041 = vmatprep.subr.bf16.mxu1 %v7076_v46  ;;  %6107 = vmatprep.subr.bf16.mxu0 %v7077_v33  ;;  %v7131_v46 = vld [vmem:[%s7581_s9 + $0x5d8] ss:$20 sps:$4 sm:$0xff]   ;;  %v7132_v33 = vld [vmem:[%s7581_s9 + $0x740] ss:$20 sps:$4 sm:$0xff]  }
 0x2c4   : > { %6042 = vmatpush3.bf16.msra.mxu1 %v7078_v31  ;;  %v7133_v31 = vld [vmem:[%s7581_s9 + $0x600] ss:$20 sps:$4 sm:$0xff]  }
 0x2c5   : > { %6108 = vmatpush3.bf16.msra.mxu0 %v7079_v34  ;;  %6043 = vmatprep.subr.bf16.mxu1 %v7080_v35  ;;  %v7134_v34 = vld [vmem:[%s7581_s9 + $0x768] ss:$20 sps:$4 sm:$0xff]  }
 0x2c6   : > { %6109 = vmatprep.subr.bf16.mxu0 %v7081_v37  ;;  %v7135_v35 = vld [vmem:[%s7581_s9 + $0x628] ss:$20 sps:$4 sm:$0xff]   ;;  %v7136_v37 = vld [vmem:[%s7581_s9 + $0xb50] ss:$20 sps:$4 sm:$0xff]  }
 0x2c8   : > { %6044 = vmatpush3.bf16.msra.mxu1 %v7082_v23  ;;  %v7137_v23 = vld [vmem:[%s7581_s9 + $0xa10] ss:$20 sps:$4 sm:$0xff]  }
 0x2c9   : > { %6110 = vmatpush3.bf16.msra.mxu0 %v7083_v0  ;;  %6045 = vmatprep.subr.bf16.mxu1 %v7084_v38  ;;  %v7138_v0 = vld [vmem:[%s7581_s9 + $0xb78] ss:$20 sps:$4 sm:$0xff]  }
 0x2ca   : > { %6111 = vmatprep.subr.bf16.mxu0 %v7085_v39  ;;  %v7139_v38 = vld [vmem:[%s7581_s9 + $0xa38] ss:$20 sps:$4 sm:$0xff]   ;;  %v7140_v39 = vld [vmem:[%s7581_s9 + $0xba0] ss:$20 sps:$4 sm:$0xff]  }
 0x2cc   : > { %6046 = vmatpush3.bf16.msra.mxu1 %v7086_v19  ;;  %v7141_v19 = vld [vmem:[%s7581_s9 + $0xa60] ss:$20 sps:$4 sm:$0xff]  }
 0x2cd   : > { %6112 = vmatpush3.bf16.msra.mxu0 %v7087_v40  ;;  %6047 = vmatprep.subr.bf16.mxu1 %v7088_v41  ;;  %v7142_v40 = vld [vmem:[%s7581_s9 + $0xbc8] ss:$20 sps:$4 sm:$0xff]  }
 0x2ce   : > { %6113 = vmatprep.subr.bf16.mxu0 %v7089_v44  ;;  %v7143_v41 = vld [vmem:[%s7581_s9 + $0xa88] ss:$20 sps:$4 sm:$0xff]   ;;  %v7145_v44 = vld [vmem:[%s7581_s9 + $0xab0] ss:$20 sps:$4 sm:$0xff]  }
 0x2d0   : > { %6048 = vmatpush3.bf16.msra.mxu1 %v7090_v32  ;;  %v7147_v32 = vld [vmem:[%s7581_s9 + $0xad8] ss:$20 sps:$4 sm:$0xff]  }
 0x2d1   : > { %6114 = vmatpush3.bf16.msra.mxu0 %v7091_v45  ;;  %6049 = vmatprep.subr.bf16.mxu1 %v7092_v47  ;;  %v7148_v45 = vld [vmem:[%s7581_s9 + $0xc40] ss:$20 sps:$4 sm:$0xff]  }
 0x2d2   : > { %6115 = vmatprep.subr.bf16.mxu0 %v7093_v48  ;;  %v7149_v47 = vld [vmem:[%s7581_s9 + $0xb00] ss:$20 sps:$4 sm:$0xff]   ;;  %v7150_v48 = vld [vmem:[%s7581_s9 + $0xc68] ss:$20 sps:$4 sm:$0xff]  }
 0x2d4   : > { %6050 = vmatpush3.bf16.msra.mxu1 %v7094_v50  ;;  %v7151_v50 = vld [vmem:[%s7581_s9 + $0xb28] ss:$20 sps:$4 sm:$0xff]  }
 0x2d5   : > { %6116 = vmatpush3.bf16.msra.mxu0 %v7095_v51  ;;  %6051 = vmatprep.subr.bf16.mxu1 %v7096_v52  ;;  %v2545_v51 = vld [vmem:[%s286_s25] sm:$0x1f]  ;;  %v7364_v52 = vmov 1983009808  }
 0x2d6   : > { %6117 = vmatprep.subr.bf16.mxu0 %v7097_v53  ;;  %v5270_v53 = vunpack.c.l.s4 %v7364_v52 }
 0x2d8   : > { %6052 = vmatpush3.bf16.msra.mxu1 %v7098_v54  ;;  %v2550_v54 = vrot.slane %v2545_v51, %v7687_v24 }
 0x2d9   : > { %6118 = vmatpush3.bf16.msra.mxu0 %v7099_v56  ;;  %6053 = vmatprep.subr.bf16.mxu1 %v7100_v57  ;;  %v2558_v56 = vrot.slane %v2545_v51, %v505_v4  ;;  %v2554_v57 = vrot.slane %v2545_v51, %v7692_v28 }
 0x2da   : > { %6119 = vmatprep.subr.bf16.mxu0 %v7101_v59  ;;  %v5271_v59 = vunpack.c.0.s8 %v5270_v53 }
 0x2dc   : > { %6054 = vmatpush3.bf16.msra.mxu1 %v7102_v60 }
 0x2dd   : > { %6120 = vmatpush3.bf16.msra.mxu0 %v7103_v7  ;;  %6061 = vmatprep.subr.bf16.mxu1 %v7104_v63 }
 0x2df   : > { %5095 = vmatmul.mubr.bf16.vlgmr.msra.gmra.mrb[12].mxu1 %v7714_v1  ;;  %v7111_v1 = vld [vmem:[%s7581_s9 + $0x308] ss:$20 sps:$4 sm:$0xff]  }
 0x2e0   : > { %5215 = vmatmul.mubr.bf16.vlgmr.msra.gmra.mrb[16].mxu0 %v7991_v26  ;;  %6062 = vmatpush3.bf16.msra.mxu1 %v7105_v55  ;;  %v7112_v26 = vld [vmem:[%s7581_s9 + $0x470] ss:$20 sps:$4 sm:$0xff]  }
 0x2e1   : > { %5134 = vmatprep.mubr.bf16.mxu1 %v7729_v13  ;;  %6063 = vmatprep.subr.bf16.mxu1 %v7106_v58  ;;  %v7114_v13 = vld [vmem:[%s7581_s9 + $0x498] ss:$20 sps:$4 sm:$0xff]  }
 0x2e4   : > { %6064 = vmatpush3.bf16.msra.mxu1 %v7107_v49 }
 0x2e5   : > { %6065 = vmatprep.subr.bf16.mxu1 %v7108_v2 }
 0x2e8   : > { %6066 = vmatpush3.bf16.msra.mxu1 %v7109_v3  ;;  %v5274_v3 = vsub.s32 %v5271_v59, %v7587_v36 }
 0x2e9   : > { %6067 = vmatprep.subr.bf16.mxu1 %v7110_v25 }
 0x2ec   : > { %6068 = vmatpush3.bf16.msra.mxu1 %v7111_v1 }
 0x2ed   : > { %6069 = vmatprep.subr.bf16.mxu1 %v7112_v26 }
 0x2f0   : > { %6070 = vmatpush3.bf16.msra.mxu1 %v7113_v6 }
 0x2f1   : > { %6071 = vmatprep.subr.bf16.mxu1 %v7114_v13 }
 0x2f4   : > { %6072 = vmatpush3.bf16.msra.mxu1 %v7115_v8 }
 0x2f5   : > { %6073 = vmatprep.subr.bf16.mxu1 %v7116_v9 }
 0x2f8   : > { %6074 = vmatpush3.bf16.msra.mxu1 %v7117_v10 }
 0x2f9   : > { %6075 = vmatprep.subr.bf16.mxu1 %v7118_v12 }
 0x2fc   : > { %6076 = vmatpush3.bf16.msra.mxu1 %v7119_v15 }
 0x2fd   : > { %6083 = vmatprep.subr.bf16.mxu1 %v7120_v11 }
 0x2ff   : > { %5135 = vmatmul.mubr.bf16.vlgmr.msra.gmra.mrb[16].mxu1 %v7808_v42  ;;  %v7128_v42 = vld [vmem:[%s7581_s9 + $0x6f0] ss:$20 sps:$4 sm:$0xff]  }
 0x300   : > { %6084 = vmatpush3.bf16.msra.mxu1 %v7121_v18  ;;  %5174 = vmatprep.mubr.bf16.mxu1 %v7828_v62  ;;  %v7130_v62 = vld [vmem:[%s7581_s9 + $0x718] ss:$20 sps:$4 sm:$0xff]  }
 0x301   : > { %6085 = vmatprep.subr.bf16.mxu1 %v7122_v5 }
 0x304   : > { %6086 = vmatpush3.bf16.msra.mxu1 %v7123_v16 }
 0x305   : > { %6087 = vmatprep.subr.bf16.mxu1 %v7124_v20 }
 0x308   : > { %6088 = vmatpush3.bf16.msra.mxu1 %v7125_v21 }
 0x309   : > { %6089 = vmatprep.subr.bf16.mxu1 %v7126_v22  ;;  %v2566_v22 = vrot.slane %v2545_v51, %v513_v61 }
 0x30c   : > { %6090 = vmatpush3.bf16.msra.mxu1 %v7127_v27 }
 0x30d   : > { %6091 = vmatprep.subr.bf16.mxu1 %v7128_v42 }
 0x310   : > { %6092 = vmatpush3.bf16.msra.mxu1 %v7129_v30 }
 0x311   : > { %6093 = vmatprep.subr.bf16.mxu1 %v7130_v62 }
 0x314   : > { %6094 = vmatpush3.bf16.msra.mxu1 %v7131_v46 }
 0x315   : > { %6095 = vmatprep.subr.bf16.mxu1 %v7132_v33 }
 0x318   : > { %6096 = vmatpush3.bf16.msra.mxu1 %v7133_v31 }
 0x319   : > { %6097 = vmatprep.subr.bf16.mxu1 %v7134_v34 }
 0x31c   : > { %6098 = vmatpush3.bf16.msra.mxu1 %v7135_v35 }
 0x31d   : > { %6127 = vmatprep.subr.bf16.mxu1 %v7136_v37 }
 0x31f   : > { %5175 = vmatmul.mubr.bf16.vlgmr.msra.gmra.mrb[20].mxu1 %v7899_v17  ;;  %v7144_v17 = vld [vmem:[%s7581_s9 + $0xbf0] ss:$20 sps:$4 sm:$0xff]  }
 0x320   : > { %6128 = vmatpush3.bf16.msra.mxu1 %v7137_v23  ;;  %5254 = vmatprep.mubr.bf16.mxu1 %v7995_v14  ;;  %v7146_v14 = vld [vmem:[%s7581_s9 + $0xc18] ss:$20 sps:$4 sm:$0xff]   ;;  %s8182_s9 = scalar_lea.hbm %s8232_s5, %s6038_s16 }
 0x321   : > { %6129 = vmatprep.subr.bf16.mxu1 %v7138_v0 }
 0x324   : > { %6130 = vmatpush3.bf16.msra.mxu1 %v7139_v38 }
 0x325   : > { %6131 = vmatprep.subr.bf16.mxu1 %v7140_v39 }
 0x328   : > { %6132 = vmatpush3.bf16.msra.mxu1 %v7141_v19 }
 0x329   : > { %6133 = vmatprep.subr.bf16.mxu1 %v7142_v40 }
 0x32c   : > { %6134 = vmatpush3.bf16.msra.mxu1 %v7143_v41 }
 0x32d   : > { %6135 = vmatprep.subr.bf16.mxu1 %v7144_v17 }
 0x330   : > { %6136 = vmatpush3.bf16.msra.mxu1 %v7145_v44 }
 0x331   : > { %6137 = vmatprep.subr.bf16.mxu1 %v7146_v14 }
 0x334   : > { %6138 = vmatpush3.bf16.msra.mxu1 %v7147_v32 }
 0x335   : > { %6139 = vmatprep.subr.bf16.mxu1 %v7148_v45 }
 0x338   : > { %6140 = vmatpush3.bf16.msra.mxu1 %v7149_v47 }
 0x339   : > { %6141 = vmatprep.subr.bf16.mxu1 %v7150_v48 }
 0x33c   : > { %6142 = vmatpush3.bf16.msra.mxu1 %v7151_v50 }
 0x33f   : > { %5255 = vmatmul.mubr.bf16.vlgmr.msra.gmra.mrb[24].mxu1 %v8069_v29  ;;  %v2562_v29 = vrot.slane %v2545_v51, %v509_v43 }
 0x392   : > { %v4850_v60 = vpop.f32.mrb[8].mxu1  ;;  %v5055_v7 = vpop.f32.mrb[12].mxu0 }
 0x393   : > { %v6159_v63 = vadd.f32 %v4850_v60, %v2550_v54  ;;  %v6161_v55 = vadd.f32 %v5055_v7, %v2558_v56  ;;  %v4852_v58 = vpop.f32.mrb[9].mxu1  ;;  %v5057_v49 = vpop.f32.mrb[13].mxu0 }
 0x394   : > { %v6160_v2 = vadd.f32 %v4852_v58, %v2554_v57  ;;  %v6162_v24 = vadd.f32 %v5057_v49, %v2562_v29  ;;  %v4854_v25 = vpop.f32.mrb[10].mxu1  ;;  %v5059_v1 = vpop.f32.mrb[14].mxu0 }
 0x395   : > { %v4855_v4 = vpop.f32.mrb[11].mxu1  ;;  %v5060_v26 = vpop.f32.mrb[15].mxu0 }
 0x396   : > { %v5267_v28 = vcombine.low %v6159_v63, %v6160_v2  ;;  %v5268_v6 = vcombine.low %v6161_v55, %v6162_v24 }
 0x398   : > { %v5275_v13 = vrot.slane %v5267_v28, %v5274_v3  ;;  %v5282_v8 = vrot.slane %v5268_v6, %v5274_v3 }
 0x39a   : > { %v5283_v43 = vcombine.low %v5275_v13, %v5282_v8 }
 0x39c   : > { %5293 = vst [vmem:[%s8172_s8] sm:$0xff] %v5283_v43 }
 0x3b2   : > { %v6055_v9 = vpop.f32.mrb[12].mxu1 }
 0x3b3   : > { %v6121_v10 = vpop.f32.mrb[16].mxu0  ;;  %v6056_v12 = vpop.f32.mrb[13].mxu1 }
 0x3b4   : > { %v6057_v15 = vadd.f32 %v6056_v12, %v6055_v9  ;;  %v6122_v11 = vpop.f32.mrb[17].mxu0  ;;  %v6058_v18 = vpop.f32.mrb[14].mxu1 }
 0x3b5   : > { %v6123_v5 = vadd.f32 %v6122_v11, %v6121_v10  ;;  %v6124_v16 = vpop.f32.mrb[18].mxu0  ;;  %v6059_v20 = vpop.f32.mrb[15].mxu1 }
 0x3b6   : > { %v6125_v21 = vpop.f32.mrb[19].mxu0  ;;  %v5097_v30 = vadd.f32 %v6057_v15, %v2566_v22 }
 0x3d2   : > { %v6077_v27 = vpop.f32.mrb[16].mxu1 }
 0x3d3   : > { %v6078_v42 = vpop.f32.mrb[17].mxu1 }
 0x3d4   : > { %v6079_v62 = vadd.f32 %v6078_v42, %v6077_v27  ;;  %v6080_v46 = vpop.f32.mrb[18].mxu1 }
 0x3d5   : > { %v6081_v33 = vpop.f32.mrb[19].mxu1 }
 0x3d6   : > { %v5137_v31 = vadd.f32 %v6079_v62, %v5097_v30 }
 0x3f2   : > { %v6099_v34 = vpop.f32.mrb[20].mxu1 }
 0x3f3   : > { %v6100_v35 = vpop.f32.mrb[21].mxu1 }
 0x3f4   : > { %v6101_v37 = vadd.f32 %v6100_v35, %v6099_v34  ;;  %v6102_v23 = vpop.f32.mrb[22].mxu1 }
 0x3f5   : > { %v6103_v0 = vpop.f32.mrb[23].mxu1 }
 0x3f6   : > { %v5177_v38 = vadd.f32 %v6101_v37, %v5137_v31 }
 0x3f8   : > { %v5217_v36 = vadd.f32 %v6123_v5, %v5177_v38 }
 0x412   : > { %v6143_v61 = vpop.f32.mrb[24].mxu1 }
 0x413   : > { %v6144_v39 = vpop.f32.mrb[25].mxu1 }
 0x414   : > { %v6145_v19 = vadd.f32 %v6144_v39, %v6143_v61  ;;  %v6146_v40 = vpop.f32.mrb[26].mxu1 }
 0x415   : > { %v6147_v41 = vpop.f32.mrb[27].mxu1 }
 0x416   : > { %v5257_v17 = vadd.f32 %v6145_v19, %v5217_v36 }
 0x418   : > { %6033 = vst.sshfl [vmem:[%s8172_s8 + $0x8] sm:$0x3 pattern:$0x76325410] %v5257_v17 }
 0x419   : > { %7292 = shalt.err (!%p7289_p1)
}
 0x41a   : > { %s7293_s27 = scalar_lea.hbm %s8182_s9, 160  ;;  %s7297_s26 = scalar_lea.hbm %s8232_s5, 320 }
 0x41b   : > { %p7294_p11 = scmp.ne.s32.totalorder %s8182_s9, %s7293_s27  ;;  %p7298_p4 = scmp.lt.u32.totalorder %s8182_s9, %s8232_s5 }
 0x41c   : > { %p7299_p9 = scmp.lt.u32.totalorder %s7297_s26, %s7293_s27  ;;  %p7301_p10 = scmp.lt.u32.totalorder %s7293_s27, %s8182_s9 }
 0x41d   : > { %p7295_p3 = pnand %p7294_p11, %p8256_p2 }
 0x41e   : > { %p7300_p5 = por %p7299_p9, %p7298_p4 }
 0x41f   : > { %p7296_p8 = pneg %p7295_p3 }
 0x420   : > { %p7302_p0 = por %p7301_p10, %p7300_p5 }
 0x422   : > { %p7303_p7 = pnand %p7302_p0, %p7296_p8 }
 0x424   : > { %7306 = shalt.err (!%p7303_p7)
}
 0x425   : > { %6228 = dma.vmem_to_hbm [thread:$0]  (%p8256_p2), %s8184_s11, 160, %s8182_s9, %s5296_s29  }
 0x426 PF: > { %s5322_s25 = sand.u32 1, %s7341_s18   ;;  %p8257_p6 = scmp.ne.s32.totalorder %s8243_s6, 0 }
 0x427   : > { %p8258_p12 = scmp.ge.s32.totalorder %s7353_s21, 2  ;;  %s5323_s28 = scalar_lea.sflag [#allocation4], %s5322_s25 }
 0x429   : > { %p6242_p13 = pnand %p8258_p12, %p8257_p6 }
 0x42b   : > { %7336 = dma.done.wait (!%p6242_p13), %s5323_s28, 160  }
 0x42c   : > { %7338 = vsyncadd (!%p6242_p13), %s5323_s28, 4294967136  ;;  %s8259_s8 = sld [smem:[#allocation13_spill]]  ;;  %p17_p1 = scmp.ge.s32.totalorder %s7421_s24, 4  }
 0x42d   : > { %s8260_s18 = smov %s7345_s19  ;;  %s8261_s19 = smov %s7349_s20 }
 0x42e   : > { %s8263_s21 = smov %s7421_s24  ;;  %19 = sbr.rel (!%p17_p1) target bundleno = 7 (0x7), region = 95 }
 0x432   : > { %s8262_s20 = smov %s8259_s8 }
 0x435   :  { %5328 = vsyncpa [#allocation3], 1 }
 0x436   :  { %5330 = vsyncpa [#allocation3 + $0x1], 1 }
 0x437   :  { %5331 = vsyncpa [#allocation6], 1 }
 0x438   :  { %5332 = vsyncpa [#allocation4], 1 }
 0x439   :  { %5334 = vsyncpa [#allocation4 + $0x1], 1 }

</bundles_post_ra>
